<compile_context>
chip_gen: v7x
topology: tpu7x:2x2x1
jax: 0.10.0
libtpu: 0.0.40
codegen_flags: <defaults>
</compile_context>

<pallas_src>
import functools

import jax
import jax.numpy as jnp
from jax.experimental import pallas as pl
from jax.experimental.pallas import tpu as pltpu

LANES = 128


def _round_up(x, m):
    return (x + m - 1) // m * m


def _vmem_capacity_bytes():
    try:
        return int(pltpu.get_tpu_info().vmem_capacity_bytes)
    except Exception:
        return 64 << 20            # conservative fallback (v7x per-core VMEM)


# ---------- kernel 1: conv tile (single big-K MXU dot) + BN partial statistics ----------

def _conv_stats_kernel(x_ref, w_ref, y_ref, psum_ref, psq_ref, *, k, s, tile_h, Wo):
    # x_ref   : (band_h, Wp, C1)  bf16  -- input rows feeding tile_h output rows
    # w_ref   : (k*k*C1, C2P)     bf16  -- im2col-folded weights (resident block)
    # y_ref   : (tile_h, Wo, C2P) bf16  -- conv output tile
    # psum/psq: (1, C2P)          f32   -- per-grid-step BN partial sums
    C1 = x_ref.shape[-1]
    C2P = y_ref.shape[-1]
    tile_m = tile_h * Wo

    xb = x_ref[...]                               # single staging load of the band
    patches = []
    for ki in range(k):                           # static tap loop -> one concat, ONE dot
        for kj in range(k):
            if s == 1:
                patches.append(xb[ki:ki + tile_h, kj:kj + Wo, :])
            else:
                # TODO(synk): stride>1 path (static strided value slice), untested on HW.
                patches.append(jax.lax.slice(
                    xb, (ki, kj, 0),
                    (ki + (tile_h - 1) * s + 1, kj + (Wo - 1) * s + 1, C1),
                    (s, s, 1)))
    col = jnp.concatenate(patches, axis=-1).reshape(tile_m, k * k * C1)

    acc = jnp.dot(col, w_ref[...], preferred_element_type=jnp.float32)

    y_ref[...] = acc.reshape(tile_h, Wo, C2P).astype(y_ref.dtype)   # bf16 writeback
    psum_ref[...] = jnp.sum(acc, axis=0, keepdims=True)             # f32 partials
    psq_ref[...] = jnp.sum(acc * acc, axis=0, keepdims=True)


# ---------- kernel 2: fused normalize + SiLU (streaming, lane-dense) ----------

def _bn_silu_kernel(y_ref, scale_ref, shift_ref, o_ref):
    z = y_ref[...].astype(jnp.float32) * scale_ref[...] + shift_ref[...]
    o_ref[...] = z * jax.nn.sigmoid(z)            # SiLU


# ---------- wrapper ----------

def conv_bn_silu(x_nchw, weight, gamma, beta, k, s, eps=1e-5):
    """weight: (C2, C1, k, k) as in PyTorch nn.Conv2d.  Returns NCHW float32.

    BatchNorm uses training-mode semantics (batch mean / biased variance), i.e.
    the behavior of a freshly constructed PyTorch module's forward pass.
    """
    N, C1, H, W = x_nchw.shape
    C2 = weight.shape[0]
    p = k // 2                                    # autopad(k, None, 1)
    Ho = (H + 2 * p - k) // s + 1
    Wo = (W + 2 * p - k) // s + 1
    Hp, Wp = H + 2 * p, W + 2 * p
    C2P = _round_up(C2, LANES)                    # lane-dense output channels
    M = N * Ho * Wo
    KK = k * k * C1

    # ---- per-generation VMEM budgeting & spatial tile selection ----
    cap = _vmem_capacity_bytes()
    budget = int(cap * 0.45)

    def _need1(th):                               # kernel-1 per-step VMEM estimate
        band_h = (th - 1) * s + k
        tm = th * Wo
        band = band_h * Wp * C1 * 2               # bf16 input band block
        wb = KK * C2P * 2                         # bf16 weight block
        yb = tm * C2P * 2                         # bf16 y block
        stats = 2 * C2P * 4
        col = tm * KK * 2                         # im2col staging value
        acc = tm * C2P * 4                        # f32 accumulator value
        return 2 * (band + wb + yb + stats) + band + col + acc + (1 << 20)

    max_th = max(1, min(Ho, 2048 // max(Wo, 1)))  # cap tile at ~2048 flattened rows
    tile_h = 1
    for d in range(max_th, 0, -1):                # largest divisor of Ho that fits budget
        if Ho % d == 0 and _need1(d) <= budget:
            tile_h = d
            break
    nH = Ho // tile_h
    band_h = (tile_h - 1) * s + k

    tile_m2 = M if M <= 1024 else 1024            # kernel-2 row tile (>= roofline knee)
    need2 = 2 * (tile_m2 * C2P * 2 + tile_m2 * C2P * 4 + 2 * C2P * 4) + (1 << 20)
    need = max(_need1(tile_h), need2)
    vmem_limit = int(min(max(need * 5 // 4, 32 << 20), cap - (8 << 20)))

    # ---- glue: NCHW -> padded NHWC bf16, banded along H; OIHW -> (k*k*C1, C2P) bf16 ----
    x = jnp.transpose(x_nchw, (0, 2, 3, 1)).astype(jnp.bfloat16)
    x_pad = jnp.pad(x, ((0, 0), (p, p), (p, p), (0, 0)))
    # Overlapping row bands (halo = k - s rows) so the kernel needs only blocked tiles.
    x_bands = jnp.stack(
        [x_pad[:, t * tile_h * s: t * tile_h * s + band_h] for t in range(nH)],
        axis=1)                                    # (N, nH, band_h, Wp, C1)
    w = jnp.transpose(weight, (2, 3, 1, 0)).reshape(KK, C2)
    w = jnp.pad(w, ((0, 0), (0, C2P - C2))).astype(jnp.bfloat16)

    # ---- kernel 1: conv (single big-K dot per tile) + per-step BN partials ----
    kern = functools.partial(_conv_stats_kernel, k=k, s=s, tile_h=tile_h, Wo=Wo)
    y, psum, psq = pl.pallas_call(
        kern,
        out_shape=(jax.ShapeDtypeStruct((N, Ho, Wo, C2P), jnp.bfloat16),
                   jax.ShapeDtypeStruct((N, nH, 1, C2P), jnp.float32),
                   jax.ShapeDtypeStruct((N, nH, 1, C2P), jnp.float32)),
        grid=(N, nH),
        in_specs=[pl.BlockSpec((None, None, band_h, Wp, C1),
                               lambda n, t: (n, t, 0, 0, 0)),
                  pl.BlockSpec((KK, C2P), lambda n, t: (0, 0))],
        out_specs=(pl.BlockSpec((None, tile_h, Wo, C2P), lambda n, t: (n, t, 0, 0)),
                   pl.BlockSpec((None, None, 1, C2P), lambda n, t: (n, t, 0, 0)),
                   pl.BlockSpec((None, None, 1, C2P), lambda n, t: (n, t, 0, 0))),
        compiler_params=pltpu.CompilerParams(
            # every grid step writes distinct blocks -> both axes parallel (v7x megacore)
            dimension_semantics=("parallel", "parallel"),
            vmem_limit_bytes=vmem_limit),
    )(x_bands, w)

    # ---- tiny XLA epilogue: reduce partials, fold BN affine ----
    sums = jnp.sum(psum, axis=(0, 1, 2))                     # (C2P,)
    sqs = jnp.sum(psq, axis=(0, 1, 2))
    mean = sums / M
    var = jnp.maximum(sqs / M - mean * mean, 0.0)            # biased var, clamped >= 0
    # TODO(synk): single-pass E[x^2]-E[x]^2 can lose digits for very large M.
    gamma_p = jnp.pad(gamma.astype(jnp.float32), (0, C2P - C2))
    beta_p = jnp.pad(beta.astype(jnp.float32), (0, C2P - C2))
    scale = (gamma_p * jax.lax.rsqrt(var + eps)).reshape(1, C2P)
    shift = (beta_p - mean * (gamma_p * jax.lax.rsqrt(var + eps))).reshape(1, C2P)

    # ---- kernel 2: fused normalize + SiLU over flattened rows ----
    y_flat = y.reshape(M, C2P)                               # free collapse of leading dims
    out_flat = pl.pallas_call(
        _bn_silu_kernel,
        out_shape=jax.ShapeDtypeStruct((M, C2P), jnp.float32),
        grid=(pl.cdiv(M, tile_m2),),
        in_specs=[pl.BlockSpec((tile_m2, C2P), lambda i: (i, 0)),
                  pl.BlockSpec((1, C2P), lambda i: (0, 0)),
                  pl.BlockSpec((1, C2P), lambda i: (0, 0))],
        out_specs=pl.BlockSpec((tile_m2, C2P), lambda i: (i, 0)),
        compiler_params=pltpu.CompilerParams(
            dimension_semantics=("parallel",),
            vmem_limit_bytes=vmem_limit),
    )(y_flat, scale, shift)

    # glue: drop channel padding, back to NCHW at the module boundary.
    out = out_flat.reshape(N, Ho, Wo, C2P)[..., :C2]
    return jnp.transpose(out, (0, 3, 1, 2))


# ---------- pure-JAX reference (matching the kernel's bf16 rounding points) ----------

def reference(x, weight, gamma, beta, k, s, eps=1e-5):
    # Same bf16-rounded operands and same bf16 intermediate storage as the kernel,
    # so the comparison isolates kernel correctness from quantization choices.
    xq = x.astype(jnp.bfloat16).astype(jnp.float32)
    wq = weight.astype(jnp.bfloat16).astype(jnp.float32)
    p = k // 2
    y = jax.lax.conv_general_dilated(
        xq, wq, window_strides=(s, s), padding=((p, p), (p, p)),
        dimension_numbers=("NCHW", "OIHW", "NCHW"))
    mean = jnp.mean(y, axis=(0, 2, 3), keepdims=True)         # stats from f32 conv
    var = jnp.mean((y - mean) ** 2, axis=(0, 2, 3), keepdims=True)
    yq = y.astype(jnp.bfloat16).astype(jnp.float32)            # kernel stores y in bf16
    z = (yq - mean) * jax.lax.rsqrt(var + eps)
    z = z * gamma.reshape(1, -1, 1, 1) + beta.reshape(1, -1, 1, 1)
    return z * jax.nn.sigmoid(z)


if __name__ == "__main__":
    # Conv(c1=4, c2=8, k=3, s=1) on a (2, 4, 16, 16) NCHW input.
    c1, c2, k, s = 4, 8, 3, 1
    N, H, W = 2, 16, 16

    key = jax.random.PRNGKey(0)
    kx, kw = jax.random.split(key)
    x = jax.random.normal(kx, (N, c1, H, W), dtype=jnp.float32)
    weight = jax.random.normal(kw, (c2, c1, k, k), dtype=jnp.float32) * 0.1
    gamma = jnp.ones((c2,), jnp.float32)    # PyTorch BatchNorm2d default init
    beta = jnp.zeros((c2,), jnp.float32)

    out = conv_bn_silu(x, weight, gamma, beta, k, s)
    out = jax.block_until_ready(out)

    ref = reference(x, weight, gamma, beta, k, s)
    assert out.shape == ref.shape == (N, c2, H, W)
    max_err = float(jnp.max(jnp.abs(out - ref)))
    assert jnp.allclose(out, ref, rtol=2e-3, atol=2e-3), max_err

    print("KERNEL_OK")
</pallas_src>

<mosaic_0001>
module attributes {stable_mosaic.version = 11 : i64} {
  func.func @_conv_stats_kernel(%arg0: i32, %arg1: i32, %arg2: memref<1x1x18x18x4xbf16, #tpu.memory_space<vmem>>, %arg3: memref<36x128xbf16, #tpu.memory_space<vmem>>, %arg4: memref<1x16x16x128xbf16, #tpu.memory_space<vmem>>, %arg5: memref<1x1x1x128xf32, #tpu.memory_space<vmem>>, %arg6: memref<1x1x1x128xf32, #tpu.memory_space<vmem>>) attributes {dimension_semantics = [#tpu.dimension_semantics<parallel>, #tpu.dimension_semantics<parallel>], iteration_bounds = array<i64: 2, 1>, scalar_prefetch = 0 : i64, scratch_operands = 0 : i64, tpu.core_type = #tpu.core_type<tc>, window_params = [{transform_indices = @transform_0, window_bounds = array<i64: 1, 1, 18, 18, 4>}, {pipeline_mode = #tpu.pipeline_mode<synchronous>, transform_indices = @transform_1, window_bounds = array<i64: 36, 128>}, {transform_indices = @transform_2, window_bounds = array<i64: 1, 16, 16, 128>}, {transform_indices = @transform_3, window_bounds = array<i64: 1, 1, 1, 128>}, {transform_indices = @transform_4, window_bounds = array<i64: 1, 1, 1, 128>}]} {
    %c0 = arith.constant 0 : index
    %c0_0 = arith.constant 0 : index
    %c0_1 = arith.constant 0 : index
    %c0_2 = arith.constant 0 : index
    %c0_3 = arith.constant 0 : index
    %0 = vector.load %arg2[%c0, %c0_0, %c0_1, %c0_2, %c0_3] : memref<1x1x18x18x4xbf16, #tpu.memory_space<vmem>>, vector<1x1x18x18x4xbf16>
    %1 = vector.shape_cast %0 : vector<1x1x18x18x4xbf16> to vector<18x18x4xbf16>
    %2 = vector.extract_strided_slice %1 {offsets = [0, 0, 0], sizes = [16, 16, 4], strides = [1, 1, 1]} : vector<18x18x4xbf16> to vector<16x16x4xbf16>
    %3 = vector.extract_strided_slice %1 {offsets = [0, 1, 0], sizes = [16, 16, 4], strides = [1, 1, 1]} : vector<18x18x4xbf16> to vector<16x16x4xbf16>
    %4 = vector.extract_strided_slice %1 {offsets = [0, 2, 0], sizes = [16, 16, 4], strides = [1, 1, 1]} : vector<18x18x4xbf16> to vector<16x16x4xbf16>
    %5 = vector.extract_strided_slice %1 {offsets = [1, 0, 0], sizes = [16, 16, 4], strides = [1, 1, 1]} : vector<18x18x4xbf16> to vector<16x16x4xbf16>
    %6 = vector.extract_strided_slice %1 {offsets = [1, 1, 0], sizes = [16, 16, 4], strides = [1, 1, 1]} : vector<18x18x4xbf16> to vector<16x16x4xbf16>
    %7 = vector.extract_strided_slice %1 {offsets = [1, 2, 0], sizes = [16, 16, 4], strides = [1, 1, 1]} : vector<18x18x4xbf16> to vector<16x16x4xbf16>
    %8 = vector.extract_strided_slice %1 {offsets = [2, 0, 0], sizes = [16, 16, 4], strides = [1, 1, 1]} : vector<18x18x4xbf16> to vector<16x16x4xbf16>
    %9 = vector.extract_strided_slice %1 {offsets = [2, 1, 0], sizes = [16, 16, 4], strides = [1, 1, 1]} : vector<18x18x4xbf16> to vector<16x16x4xbf16>
    %10 = vector.extract_strided_slice %1 {offsets = [2, 2, 0], sizes = [16, 16, 4], strides = [1, 1, 1]} : vector<18x18x4xbf16> to vector<16x16x4xbf16>
    %11 = tpu.concatenate %2, %3, %4, %5, %6, %7, %8, %9, %10 in 2 : vector<16x16x4xbf16>, vector<16x16x4xbf16>, vector<16x16x4xbf16>, vector<16x16x4xbf16>, vector<16x16x4xbf16>, vector<16x16x4xbf16>, vector<16x16x4xbf16>, vector<16x16x4xbf16>, vector<16x16x4xbf16> -> vector<16x16x36xbf16>
    %12 = vector.shape_cast %11 : vector<16x16x36xbf16> to vector<256x36xbf16>
    %c0_4 = arith.constant 0 : index
    %c0_5 = arith.constant 0 : index
    %13 = vector.load %arg3[%c0_4, %c0_5] : memref<36x128xbf16, #tpu.memory_space<vmem>>, vector<36x128xbf16>
    %cst = arith.constant dense<0.000000e+00> : vector<256x128xf32>
    %14 = tpu.matmul %12, %13, %cst {dimension_numbers = #tpu.dot_dimension_numbers<[1], [0], [0], [1], [0, 0, 1, 1], [], []>} : vector<256x36xbf16>, vector<36x128xbf16>, vector<256x128xf32> -> vector<256x128xf32>
    %15 = vector.shape_cast %14 : vector<256x128xf32> to vector<16x16x128xf32>
    %16 = arith.truncf %15 : vector<16x16x128xf32> to vector<16x16x128xbf16>
    %c0_6 = arith.constant 0 : index
    %c0_7 = arith.constant 0 : index
    %c0_8 = arith.constant 0 : index
    %c0_9 = arith.constant 0 : index
    %17 = vector.load %arg4[%c0_6, %c0_7, %c0_8, %c0_9] : memref<1x16x16x128xbf16, #tpu.memory_space<vmem>>, vector<1x16x16x128xbf16>
    %18 = vector.shape_cast %17 : vector<1x16x16x128xbf16> to vector<16x16x128xbf16>
    %19 = vector.shape_cast %16 : vector<16x16x128xbf16> to vector<1x16x16x128xbf16>
    tpu.vector_store %arg4[%c0_6, %c0_7, %c0_8, %c0_9], %19 {strides = array<i32>} : memref<1x16x16x128xbf16, #tpu.memory_space<vmem>>, vector<1x16x16x128xbf16>,
    %cst_10 = arith.constant dense<0.000000e+00> : vector<128xf32>
    %20 = vector.multi_reduction <add>, %14, %cst_10 [0] : vector<256x128xf32> to vector<128xf32>
    %21 = vector.shape_cast %20 : vector<128xf32> to vector<1x128xf32>
    %c0_11 = arith.constant 0 : index
    %c0_12 = arith.constant 0 : index
    %c0_13 = arith.constant 0 : index
    %c0_14 = arith.constant 0 : index
    %22 = vector.load %arg5[%c0_11, %c0_12, %c0_13, %c0_14] : memref<1x1x1x128xf32, #tpu.memory_space<vmem>>, vector<1x1x1x128xf32>
    %23 = vector.shape_cast %22 : vector<1x1x1x128xf32> to vector<1x128xf32>
    %24 = vector.shape_cast %21 : vector<1x128xf32> to vector<1x1x1x128xf32>
    tpu.vector_store %arg5[%c0_11, %c0_12, %c0_13, %c0_14], %24 {strides = array<i32>} : memref<1x1x1x128xf32, #tpu.memory_space<vmem>>, vector<1x1x1x128xf32>,
    %25 = arith.mulf %14, %14 : vector<256x128xf32>
    %cst_15 = arith.constant dense<0.000000e+00> : vector<128xf32>
    %26 = vector.multi_reduction <add>, %25, %cst_15 [0] : vector<256x128xf32> to vector<128xf32>
    %27 = vector.shape_cast %26 : vector<128xf32> to vector<1x128xf32>
    %c0_16 = arith.constant 0 : index
    %c0_17 = arith.constant 0 : index
    %c0_18 = arith.constant 0 : index
    %c0_19 = arith.constant 0 : index
    %28 = vector.load %arg6[%c0_16, %c0_17, %c0_18, %c0_19] : memref<1x1x1x128xf32, #tpu.memory_space<vmem>>, vector<1x1x1x128xf32>
    %29 = vector.shape_cast %28 : vector<1x1x1x128xf32> to vector<1x128xf32>
    %30 = vector.shape_cast %27 : vector<1x128xf32> to vector<1x1x1x128xf32>
    tpu.vector_store %arg6[%c0_16, %c0_17, %c0_18, %c0_19], %30 {strides = array<i32>} : memref<1x1x1x128xf32, #tpu.memory_space<vmem>>, vector<1x1x1x128xf32>,
    return
  }
  func.func @transform_0(%arg0: i32, %arg1: i32) -> (i32, i32, i32, i32, i32) {
    %c0_i32 = arith.constant 0 : i32
    %c0_i32_0 = arith.constant 0 : i32
    %c0_i32_1 = arith.constant 0 : i32
    %c0_i32_2 = arith.constant 0 : i32
    return %arg0, %arg1, %c0_i32, %c0_i32_0, %c0_i32_1 : i32, i32, i32, i32, i32
  }
  func.func @transform_1(%arg0: i32, %arg1: i32) -> (i32, i32) {
    %c0_i32 = arith.constant 0 : i32
    %c0_i32_0 = arith.constant 0 : i32
    %c0_i32_1 = arith.constant 0 : i32
    return %c0_i32, %c0_i32_0 : i32, i32
  }
  func.func @transform_2(%arg0: i32, %arg1: i32) -> (i32, i32, i32, i32) {
    %c0_i32 = arith.constant 0 : i32
    %c0_i32_0 = arith.constant 0 : i32
    %c0_i32_1 = arith.constant 0 : i32
    return %arg0, %arg1, %c0_i32, %c0_i32_0 : i32, i32, i32, i32
  }
  func.func @transform_3(%arg0: i32, %arg1: i32) -> (i32, i32, i32, i32) {
    %c0_i32 = arith.constant 0 : i32
    %c0_i32_0 = arith.constant 0 : i32
    %c0_i32_1 = arith.constant 0 : i32
    return %arg0, %arg1, %c0_i32, %c0_i32_0 : i32, i32, i32, i32
  }
  func.func @transform_4(%arg0: i32, %arg1: i32) -> (i32, i32, i32, i32) {
    %c0_i32 = arith.constant 0 : i32
    %c0_i32_0 = arith.constant 0 : i32
    %c0_i32_1 = arith.constant 0 : i32
    return %arg0, %arg1, %c0_i32, %c0_i32_0 : i32, i32, i32, i32
  }
}

</mosaic_0001>

<bundles_post_ra>
// kernel: tpu_custom_call.1
= control target key start
LH: loop header
LB: loop body
LE: loop exit
PB: predicated region body
PF: predicated region fallthrough
CT: control target
= control target key end

     0   :  { %10 = vsyncpa [#allocation3], 0  ;;  %s3200_s0 = inlined_call_operand.vmem [shape: bf16[2,1,18,18,4], index: 0, kind: input, shape index: {}]   ;;  %s3201_s1 = inlined_call_operand.vmem [shape: bf16[36,128], index: 1, kind: input, shape index: {}]   ;;  %s3202_s2 = inlined_call_operand.hbm [shape: bf16[2,16,16,128], index: 2, kind: output, shape index: {0}]   ;;  %s3203_s3 = inlined_call_operand.hbm [shape: f32[2,1,1,128], index: 3, kind: output, shape index: {1}]   ;;  %s3204_s4 = inlined_call_operand.hbm [shape: f32[2,1,1,128], index: 4, kind: output, shape index: {2}]  }
   0x1   :  { %12 = vsyncpa [#allocation3 + $0x1], 0 }
   0x2   :  { %13 = vsyncpa [#allocation5], 0 }
   0x3   :  { %15 = vsyncpa [#allocation5 + $0x1], 0  ;;  %s2497_s15 = smov 0   ;;  %s2499_s16 = smov 0  }
   0x4   :  { %s2501_s17 = smov 0   ;;  %s2503_s18 = smov 0  }
   0x5   :  { %s2505_s19 = smov 0   ;;  %s2507_s20 = smov 0  }
   0x6 LB: > { %s1912_s21 = sadd.s32 4294967295, %s2458_s20   ;;  %s1913_s22 = sadd.s32 4294967294, %s2458_s20   ;;  %s2458_s20 = sphi %s2507_s20, %s21_s20   ;;  %s2454_s19 = sphi %s2505_s19, %s3211_s19   ;;  %s2450_s18 = sphi %s2503_s18, %s3210_s18   ;;  %s2446_s17 = sphi %s2501_s17, %s3209_s17   ;;  %s2442_s16 = sphi %s2499_s16, %s3208_s16   ;;  %s2438_s15 = sphi %s2497_s15, %s3207_s15  }
   0x7   : > { %s33_s23 = sadd.s32 1, %s2454_s19  ;;  %s91_s24 = sadd.s32 1, %s2446_s17 }
   0x8   : > { %p35_p0 = scmp.ge.s32.totalorder %s33_s23, 2  ;;  %p101_p1 = scmp.ne.s32.totalorder %s2446_s17, %s2442_s16 }
   0x9   : > { %p102_p2 = scmp.eq.s32.totalorder %s1912_s21, 1  ;;  %p107_p3 = scmp.ne.s32.totalorder %s2442_s16, %s2438_s15 }
   0xa   : > { %s3213_s23 = smov (%p35_p0, %s33_s23), 0  ;;  %p108_p5 = scmp.eq.s32.totalorder %s1913_s22, 1 }
   0xb   : > { %p2539_p4 = por %p102_p2, %p101_p1  ;;  %s86_s26 = ssub.s32 %s2454_s19, %s3213_s23 }
   0xc   : > { %p1916_p6 = scmp.ge.s32.totalorder %s2458_s20, 1  ;;  %p89_p7 = scmp.eq.s32.totalorder %s86_s26, 0 }
   0xd   : > { %p2548_p8 = por %p108_p5, %p107_p3  ;;  %p197_p9 = scmp.lt.s32.totalorder %s2458_s20, 3 }
   0xe   : > { %s2554_s28 = scalar_select %p89_p7, %s2446_s17, %s91_s24  }
   0xf   : > { %p198_p10 = pnand %p1916_p6, %p197_p9 }
  0x10   : > { %p235_p11 = scmp.lt.s32.totalorder (!%p198_p10), %s2450_s18, 1  ;;  %vm653_vm0 = vcmask (!%p198_p10), 1046528   ;;  %s2460_s8 = smov (!%p198_p10), 12   ;;  %vm428_vm1 = vsmask.f32 (!%p198_p10), 7424  ;;  %v2301_v44 = vld [vmem:[%s3201_s1] sm:$0xff] (!%p198_p10)  }
  0x11   : > { %201 = sbr.rel (%p198_p10) target bundleno = 679 (0x2a7), region = 28  ;;  %s2461_s9 = smov (!%p198_p10), 20   ;;  %2160 = vmatprep.subr.bf16.mxu0 (!%p198_p10), %v2301_v44  ;;  %v2303_v46 = vld [vmem:[%s3201_s1 + $0x8] sm:$0xff] (!%p198_p10)   ;;  %2198 = vmatprep.subr.bf16.mxu1 (!%p198_p10), %v2301_v44  ;;  %v2305_v50 = vld [vmem:[%s3201_s1 + $0x10] ss:$0 sps:$4 sm:$0x33] (!%p198_p10)  }
  0x12   : > { %s2462_s10 = smov (!%p198_p10), 8   ;;  %s2463_s11 = smov (!%p198_p10), 4   ;;  %2161 = vmatpush3.bf16.msra.mxu0 (!%p198_p10), %v2301_v44  ;;  %2201 = vmatpush3.bf16.msra.mxu1 (!%p198_p10), %v2301_v44  ;;  %vm1289_vm2 = vcmask (!%p198_p10), 1041408   ;;  %vm972_vm3 = vcmask (!%p198_p10), 31744   ;;  %vm1005_vm4 = vcmask (!%p198_p10), 64512   ;;  %vm1038_vm5 = vcmask (!%p198_p10), 97280  }
  0x13   : > { %s2464_s12 = smov (!%p198_p10), 16   ;;  %s2465_s24 = smov (!%p198_p10), 24   ;;  %2162 = vmatprep.subr.bf16.mxu0 (!%p198_p10), %v2303_v46  ;;  %2199 = vmatprep.subr.bf16.mxu1 (!%p198_p10), %v2303_v46  ;;  %v1291_v54 = vsel (!%p198_p10), %vm1289_vm2, %v2305_v50, 0  ;;  %vm1071_vm6 = vcmask (!%p198_p10), 130048   ;;  %vm1104_vm7 = vcmask (!%p198_p10), 162816   ;;  %vm1137_vm8 = vcmask (!%p198_p10), 195584  }
  0x14   : > { %s2467_s13 = smov (!%p198_p10), 32   ;;  %vm1170_vm9 = vcmask (!%p198_p10), 228352   ;;  %vm1203_vm10 = vcmask (!%p198_p10), 261120   ;;  %vm1256_vm11 = vcmask (!%p198_p10), 293888   ;;  %s2468_s5 = smov (!%p198_p10), [#allocation2]  }
  0x15   : > { %s2324_s6 = sshll.u32 (!%p198_p10), %s2468_s5, 4  ;;  %s2325_s6 = int_to_ptr.vmem [resolvable:$false] %s2324_s6 }
  0x16   : > { %2163 = vmatpush3.bf16.msra.mxu0 (!%p198_p10), %v2303_v46  ;;  %2202 = vmatpush3.bf16.msra.mxu1 (!%p198_p10), %v2303_v46 }
  0x17   : > { %2204 = vmatprep.subr.msk.bf16.mxu0 (!%p198_p10), %vm1289_vm2, %v2305_v50  ;;  %2205 = vmatprep.subr.msk.bf16.mxu1 (!%p198_p10), %vm1289_vm2, %v2305_v50 }
  0x18   : > { %s236_s29 = scalar_select %p235_p11, %s2450_s18, 1 }
  0x1a   : > { %s2206_s30 = smul.u32 216, %s236_s29  ;;  %2165 = vmatpush3.bf16.msra.mxu0 %v1291_v54  ;;  %2203 = vmatpush3.bf16.msra.mxu1 %v1291_v54 }
  0x1c   : > { %s2561_s7 = scalar_lea.vmem %s3200_s0, %s2206_s30  ;;  %s2466_s30 = smov 28  }
  0x1d   : > { %v2564_v0 = vld [vmem:[%s2561_s7 + $0x18] sm:$0xff]   ;;  %v2567_v1 = vld [vmem:[%s2561_s7 + $0xc] sm:$0xff]   ;;  %v2283_v2 = vld [vmem:[%s2561_s7 + $0x14] ss:$0 sps:$4 sm:$0x11]  }
  0x1e   : > { %741 = vrot.lane.b32.xlu1 %v2564_v0, %s2460_s8  ;;  %v2573_v3 = vld [vmem:[%s2561_s7] sm:$0xff]   ;;  %739 = vrot.lane.b32.xlu0 %v2567_v1, %s2460_s8  ;;  %v657_v4 = vrot.slane %v2567_v1, 1  ;;  %v658_v5 = vrot.slane %v2283_v2, 1  ;;  %v2285_v6 = vld [vmem:[%s2561_s7 + $0x8] ss:$0 sps:$4 sm:$0x11]  }
  0x1f   : > { %v654_v7 = vrot.slane %v2573_v3, 1  ;;  %v430_v8 = vshrl.u32 %v2573_v3, 16  ;;  %v432_v9 = vshll.u32 %v2573_v3, 16  ;;  %v442_v10 = vshrl.u32 %v2567_v1, 16  ;;  %v2593_v30 = vld [vmem:[%s2561_s7 + $0x24] sm:$0xff]   ;;  %v2623_v49 = vld [vmem:[%s2561_s7 + $0x30] sm:$0xff]  }
  0x20   : > { %v659_v11 = vsel %vm653_vm0, %v657_v4, %v658_v5  ;;  %v655_v12 = vrot.slane %v2285_v6, 1  ;;  %v437_v13 = vshll.u32 %v2285_v6, 16  ;;  %v2286_v14 = vld [vmem:[%s2561_s7 + $0x20] ss:$0 sps:$4 sm:$0x11]   ;;  %v444_v15 = vshll.u32 %v2567_v1, 16 }
  0x21   : > { %v434_v16 = vrot.slane %v432_v9, 1  ;;  %v449_v17 = vshll.u32 %v2283_v2, 16  ;;  %v456_v18 = vshll.u32 %v2564_v0, 16  ;;  %v660_v23 = vrot.slane %v2564_v0, 1  ;;  %v2639_v60 = vld [vmem:[%s2561_s7 + $0x3c] sm:$0xff]  }
  0x22   : > { %821 = vrot.lane.b32.xlu0 %v659_v11, %s2461_s9  ;;  %v656_v19 = vsel %vm653_vm0, %v654_v7, %v655_v12  ;;  %v439_v20 = vrot.slane %v437_v13, 1  ;;  %v446_v21 = vrot.slane %v444_v15, 1  ;;  %v454_v25 = vshrl.u32 %v2564_v0, 16  ;;  %v2288_v33 = vld [vmem:[%s2561_s7 + $0x2c] ss:$0 sps:$4 sm:$0x11]  }
  0x23   : > { %702 = vrot.lane.b32.xlu1 %v656_v19, %s2462_s10  ;;  %v435_v22 = vor.u32 %v434_v16, %v430_v8  ;;  %v451_v24 = vrot.slane %v449_v17, 1  ;;  %v661_v26 = vrot.slane %v2286_v14, 1  ;;  %v458_v28 = vrot.slane %v456_v18, 1  ;;  %v2290_v51 = vld [vmem:[%s2561_s7 + $0x38] ss:$0 sps:$4 sm:$0x11]  }
  0x24   : > { %v447_v27 = vor.u32 %v446_v21, %v442_v10  ;;  %v461_v29 = vshll.u32 %v2286_v14, 16  ;;  %v468_v37 = vshll.u32 %v2593_v30, 16  ;;  %v466_v39 = vshrl.u32 %v2593_v30, 16  ;;  %v2292_v2 = vld [vmem:[%s2561_s7 + $0x44] ss:$0 sps:$4 sm:$0x11]  }
  0x25   : > { %v440_v31 = vsel %vm428_vm1, %v435_v22, %v439_v20  ;;  %v662_v34 = vsel %vm653_vm0, %v660_v23, %v661_v26  ;;  %v459_v35 = vor.u32 %v458_v28, %v454_v25  ;;  %v473_v41 = vshll.u32 %v2288_v33, 16  ;;  %v2664_v14 = vld [vmem:[%s2561_s7 + $0x48] sm:$0xff]   ;;  %v2294_v16 = vld [vmem:[%s2561_s7 + $0x50] ss:$0 sps:$4 sm:$0x11]   ;;  %v2677_v23 = vld [vmem:[%s2561_s7 + $0x54] sm:$0xff]  }
  0x26   : > { %621 = vrot.lane.b32.xlu0 %v440_v31, %s2463_s11  ;;  %v452_v32 = vsel %vm428_vm1, %v447_v27, %v451_v24  ;;  %v463_v36 = vrot.slane %v461_v29, 1  ;;  %v470_v40 = vrot.slane %v468_v37, 1  ;;  %v663_v47 = vrot.slane %v2593_v30, 1  ;;  %v2296_v27 = vld [vmem:[%s2561_s7 + $0x5c] ss:$0 sps:$4 sm:$0x11]  }
  0x27   : > { %704 = vrot.lane.b32.xlu1 %v659_v11, %s2462_s10  ;;  %v475_v43 = vrot.slane %v473_v41, 1  ;;  %v664_v48 = vrot.slane %v2288_v33, 1  ;;  %v480_v53 = vshll.u32 %v2623_v49, 16  ;;  %v478_v55 = vshrl.u32 %v2623_v49, 16 }
  0x28   : > { %v464_v38 = vsel %vm428_vm1, %v459_v35, %v463_v36  ;;  %v471_v42 = vor.u32 %v470_v40, %v466_v39  ;;  %v485_v57 = vshll.u32 %v2290_v51, 16  ;;  %v666_v62 = vrot.slane %v2623_v49, 1  ;;  %v2702_v39 = vld [vmem:[%s2561_s7 + $0x60] sm:$0xff]   ;;  %v2298_v41 = vld [vmem:[%s2561_s7 + $0x68] ss:$0 sps:$4 sm:$0x11]  }
  0x29   : > { %v665_v52 = vsel %vm653_vm0, %v663_v47, %v664_v48  ;;  %v482_v56 = vrot.slane %v480_v53, 1  ;;  %v667_v63 = vrot.slane %v2290_v51, 1  ;;  %v492_v4 = vshll.u32 %v2639_v60, 16  ;;  %v2715_v48 = vld [vmem:[%s2561_s7 + $0x6c] sm:$0xff]  }
  0x2a   : > { %623 = vrot.lane.b32.xlu0 %v452_v32, %s2463_s11  ;;  %v476_v45 = vsel %vm428_vm1, %v471_v42, %v475_v43  ;;  %v487_v59 = vrot.slane %v485_v57, 1  ;;  %v490_v6 = vshrl.u32 %v2639_v60, 16  ;;  %v497_v8 = vshll.u32 %v2292_v2, 16  ;;  %v2300_v53 = vld [vmem:[%s2561_s7 + $0x74] ss:$0 sps:$4 sm:$0x11]  }
  0x2b   : > { %823 = vrot.lane.b32.xlu1 %v662_v34, %s2461_s9  ;;  %v483_v58 = vor.u32 %v482_v56, %v478_v55  ;;  %v668_v5 = vsel %vm653_vm0, %v666_v62, %v667_v63  ;;  %v494_v7 = vrot.slane %v492_v4, 1  ;;  %v669_v12 = vrot.slane %v2639_v60, 1 }
  0x2c   : > { %v499_v10 = vrot.slane %v497_v8, 1  ;;  %v670_v13 = vrot.slane %v2292_v2, 1  ;;  %v504_v17 = vshll.u32 %v2664_v14, 16  ;;  %v502_v18 = vshrl.u32 %v2664_v14, 16 }
  0x2d   : > { %v488_v61 = vsel %vm428_vm1, %v483_v58, %v487_v59  ;;  %v495_v9 = vor.u32 %v494_v7, %v490_v6  ;;  %v509_v20 = vshll.u32 %v2294_v16, 16  ;;  %v672_v25 = vrot.slane %v2664_v14, 1 }
  0x2e   : > { %786 = vrot.lane.b32.xlu0 %v452_v32, %s2464_s12  ;;  %v671_v15 = vsel %vm653_vm0, %v669_v12, %v670_v13  ;;  %v506_v19 = vrot.slane %v504_v17, 1  ;;  %v673_v26 = vrot.slane %v2294_v16, 1  ;;  %v516_v28 = vshll.u32 %v2677_v23, 16  ;;  %v2304_v13 = vld [vmem:[%s2561_s7 + $0x80] ss:$0 sps:$4 sm:$0x11]  }
  0x2f   : > { %788 = vrot.lane.b32.xlu1 %v464_v38, %s2464_s12  ;;  %v500_v11 = vsel %vm428_vm1, %v495_v9, %v499_v10  ;;  %v511_v22 = vrot.slane %v509_v20, 1  ;;  %v514_v31 = vshrl.u32 %v2677_v23, 16  ;;  %v521_v33 = vshll.u32 %v2296_v27, 16  ;;  %v2740_v9 = vld [vmem:[%s2561_s7 + $0x78] sm:$0xff]  }
  0x30   : > { %v507_v21 = vor.u32 %v506_v19, %v502_v18  ;;  %v674_v29 = vsel %vm653_vm0, %v672_v25, %v673_v26  ;;  %v518_v32 = vrot.slane %v516_v28, 1  ;;  %v675_v37 = vrot.slane %v2677_v23, 1  ;;  %v2758_v28 = vld [vmem:[%s2561_s7 + $0x84] sm:$0xff]  }
  0x31   : > { %v523_v35 = vrot.slane %v521_v33, 1  ;;  %v528_v42 = vshll.u32 %v2702_v39, 16  ;;  %v526_v43 = vshrl.u32 %v2702_v39, 16  ;;  %v678_v51 = vrot.slane %v2702_v39, 1 }
  0x32   : > { %858 = vrot.lane.b32.xlu0 %v2564_v0, %s2465_s24  ;;  %v512_v24 = vsel %vm428_vm1, %v507_v21, %v511_v22  ;;  %v540_v54 = vshll.u32 %v2715_v48, 16  ;;  %v538_v56 = vshrl.u32 %v2715_v48, 16  ;;  %v545_v58 = vshll.u32 %v2300_v53, 16 }
  0x33   : > { %860 = vrot.lane.b32.xlu1 %v2593_v30, %s2465_s24  ;;  %v530_v44 = vrot.slane %v528_v42, 1  ;;  %v681_v6 = vrot.slane %v2715_v48, 1  ;;  %v682_v7 = vrot.slane %v2300_v53, 1  ;;  %v550_v19 = vshrl.u32 %v2740_v9, 16 }
  0x34   : > { %v542_v57 = vrot.slane %v540_v54, 1  ;;  %v547_v63 = vrot.slane %v545_v58, 1  ;;  %v557_v21 = vshll.u32 %v2304_v13, 16  ;;  %v684_v33 = vrot.slane %v2740_v9, 1 }
  0x35   : > { %v531_v46 = vor.u32 %v530_v44, %v526_v43 }
  0x36   : > { %905 = vrot.lane.b32.xlu0 %v464_v38, %s2466_s30  ;;  %v543_v62 = vor.u32 %v542_v57, %v538_v56 }
  0x37   : > { %907 = vrot.lane.b32.xlu1 %v476_v45, %s2466_s30 }
  0x38   : > { %v548_v4 = vsel %vm428_vm1, %v543_v62, %v547_v63 }
  0x3a   : > { %940 = vrot.lane.b32.xlu0 %v662_v34, %s2467_s13 }
  0x3b   : > { %625 = vrot.lane.b32.xlu1 %v464_v38, %s2463_s11  ;;  %v676_v38 = vrot.slane %v2296_v27, 1 }
  0x3d   : > { %v677_v40 = vsel %vm653_vm0, %v675_v37, %v676_v38  ;;  %v2307_v38 = vld [vmem:[%s2561_s7 + $0x8c] ss:$0 sps:$4 sm:$0x11]  }
  0x3e   : > { %942 = vrot.lane.b32.xlu0 %v665_v52, %s2467_s13 }
  0x3f   : > { %627 = vrot.lane.b32.xlu1 %v476_v45, %s2463_s11 }
  0x42   : > { %706 = vrot.lane.b32.xlu0 %v662_v34, %s2462_s10  ;;  %v519_v34 = vor.u32 %v518_v32, %v514_v31 }
  0x43   : > { %708 = vrot.lane.b32.xlu1 %v665_v52, %s2462_s10 }
  0x44   : > { %v524_v36 = vsel %vm428_vm1, %v519_v34, %v523_v35  ;;  %v685_v34 = vrot.slane %v2304_v13, 1 }
  0x46   : > { %743 = vrot.lane.b32.xlu0 %v2593_v30, %s2460_s8 }
  0x47   : > { %745 = vrot.lane.b32.xlu1 %v2623_v49, %s2460_s8 }
  0x4a   : > { %790 = vrot.lane.b32.xlu0 %v476_v45, %s2464_s12  ;;  %v533_v45 = vshll.u32 %v2298_v41, 16 }
  0x4b   : > { %792 = vrot.lane.b32.xlu1 %v488_v61, %s2464_s12 }
  0x4c   : > { %v535_v47 = vrot.slane %v533_v45, 1  ;;  %v686_v45 = vsel %vm653_vm0, %v684_v33, %v685_v34 }
  0x4e   : > { %825 = vrot.lane.b32.xlu0 %v665_v52, %s2461_s9  ;;  %v536_v50 = vsel %vm428_vm1, %v531_v46, %v535_v47  ;;  %v679_v52 = vrot.slane %v2298_v41, 1 }
  0x4f   : > { %827 = vrot.lane.b32.xlu1 %v668_v5, %s2461_s9 }
  0x50   : > { %v680_v55 = vsel %vm653_vm0, %v678_v51, %v679_v52  ;;  %v569_v52 = vshll.u32 %v2307_v38, 16 }
  0x52   : > { %862 = vrot.lane.b32.xlu0 %v2623_v49, %s2465_s24 }
  0x53   : > { %864 = vrot.lane.b32.xlu1 %v2639_v60, %s2465_s24 }
  0x56   : > { %909 = vrot.lane.b32.xlu0 %v488_v61, %s2466_s30 }
  0x57   : > { %911 = vrot.lane.b32.xlu1 %v500_v11, %s2466_s30 }
  0x5a   : > { %944 = vrot.lane.b32.xlu0 %v668_v5, %s2467_s13 }
  0x5b   : > { %629 = vrot.lane.b32.xlu1 %v488_v61, %s2463_s11 }
  0x5e   : > { %946 = vrot.lane.b32.xlu0 %v671_v15, %s2467_s13 }
  0x5f   : > { %631 = vrot.lane.b32.xlu1 %v500_v11, %s2463_s11 }
  0x62   : > { %710 = vrot.lane.b32.xlu0 %v668_v5, %s2462_s10 }
  0x63   : > { %712 = vrot.lane.b32.xlu1 %v671_v15, %s2462_s10 }
  0x66   : > { %747 = vrot.lane.b32.xlu0 %v2639_v60, %s2460_s8 }
  0x67   : > { %749 = vrot.lane.b32.xlu1 %v2664_v14, %s2460_s8 }
  0x6a   : > { %794 = vrot.lane.b32.xlu0 %v500_v11, %s2464_s12  ;;  %v683_v11 = vsel %vm653_vm0, %v681_v6, %v682_v7  ;;  %v687_v6 = vrot.slane %v2758_v28, 1  ;;  %v688_v7 = vrot.slane %v2307_v38, 1 }
  0x6b   : > { %796 = vrot.lane.b32.xlu1 %v512_v24, %s2464_s12 }
  0x6e   : > { %829 = vrot.lane.b32.xlu0 %v671_v15, %s2461_s9  ;;  %v552_v15 = vshll.u32 %v2740_v9, 16 }
  0x6f   : > { %831 = vrot.lane.b32.xlu1 %v674_v29, %s2461_s9 }
  0x70   : > { %v554_v20 = vrot.slane %v552_v15, 1  ;;  %v2309_v15 = vld [vmem:[%s2561_s7 + $0x98] ss:$0 sps:$4 sm:$0x11]  }
  0x72   : > { %866 = vrot.lane.b32.xlu0 %v2664_v14, %s2465_s24  ;;  %v555_v27 = vor.u32 %v554_v20, %v550_v19 }
  0x73   : > { %868 = vrot.lane.b32.xlu1 %v2677_v23, %s2465_s24 }
  0x76   : > { %913 = vrot.lane.b32.xlu0 %v512_v24, %s2466_s30 }
  0x77   : > { %915 = vrot.lane.b32.xlu1 %v524_v36, %s2466_s30 }
  0x7a   : > { %948 = vrot.lane.b32.xlu0 %v674_v29, %s2467_s13 }
  0x7b   : > { %633 = vrot.lane.b32.xlu1 %v512_v24, %s2463_s11 }
  0x7e   : > { %950 = vrot.lane.b32.xlu0 %v677_v40, %s2467_s13 }
  0x7f   : > { %635 = vrot.lane.b32.xlu1 %v524_v36, %s2463_s11 }
  0x82   : > { %714 = vrot.lane.b32.xlu0 %v674_v29, %s2462_s10 }
  0x83   : > { %716 = vrot.lane.b32.xlu1 %v677_v40, %s2462_s10 }
  0x86   : > { %751 = vrot.lane.b32.xlu0 %v2677_v23, %s2460_s8 }
  0x87   : > { %753 = vrot.lane.b32.xlu1 %v2702_v39, %s2460_s8 }
  0x8a   : > { %798 = vrot.lane.b32.xlu0 %v524_v36, %s2464_s12 }
  0x8b   : > { %800 = vrot.lane.b32.xlu1 %v536_v50, %s2464_s12 }
  0x8e   : > { %833 = vrot.lane.b32.xlu0 %v677_v40, %s2461_s9  ;;  %v564_v40 = vshll.u32 %v2758_v28, 16 }
  0x8f   : > { %835 = vrot.lane.b32.xlu1 %v680_v55, %s2461_s9 }
  0x90   : > { %v742_v59 = vpop.permute.xlu1 %741  ;;  %v740_v61 = vpop.permute.xlu0 %739  ;;  %v566_v51 = vrot.slane %v564_v40, 1 }
  0x92   : > { %870 = vrot.lane.b32.xlu0 %v2702_v39, %s2465_s24 }
  0x93   : > { %872 = vrot.lane.b32.xlu1 %v2715_v48, %s2465_s24 }
  0x94   : > { %v822_v2 = vpop.permute.xlu0 %821 }
  0x95   : > { %v703_v5 = vpop.permute.xlu1 %702 }
  0x96   : > { %917 = vrot.lane.b32.xlu0 %v536_v50, %s2466_s30 }
  0x97   : > { %919 = vrot.lane.b32.xlu1 %v548_v4, %s2466_s30 }
  0x98   : > { %v622_v8 = vpop.permute.xlu0 %621 }
  0x99   : > { %v705_v10 = vpop.permute.xlu1 %704  ;;  %v974_v17 = vsel %vm972_vm3, %v2573_v3, %v622_v8  ;;  %v559_v3 = vrot.slane %v557_v21, 1  ;;  %v581_v21 = vshll.u32 %v2309_v15, 16 }
  0x9a   : > { %952 = vrot.lane.b32.xlu0 %v680_v55, %s2467_s13  ;;  %v1007_v25 = vsel %vm1005_vm4, %v974_v17, %v703_v5 }
  0x9b   : > { %637 = vrot.lane.b32.xlu1 %v536_v50, %s2463_s11  ;;  %v1040_v32 = vsel %vm1038_vm5, %v1007_v25, %v740_v61  ;;  %v560_v37 = vsel %vm428_vm1, %v555_v27, %v559_v3  ;;  %v562_v50 = vshrl.u32 %v2758_v28, 16  ;;  %v571_v61 = vrot.slane %v569_v52, 1  ;;  %v2811_v27 = vld [vmem:[%s2561_s7 + $0x9c] sm:$0xff]  }
  0x9c   : > { %v624_v12 = vpop.permute.xlu0 %623 }
  0x9d   : > { %v824_v16 = vpop.permute.xlu1 %823  ;;  %v976_v24 = vsel %vm972_vm3, %v2567_v1, %v624_v12  ;;  %v689_v12 = vsel %vm653_vm0, %v687_v6, %v688_v7  ;;  %v693_v6 = vrot.slane %v2811_v27, 1 }
  0x9e   : > { %954 = vrot.lane.b32.xlu0 %v683_v11, %s2467_s13  ;;  %v1009_v29 = vsel %vm1005_vm4, %v976_v24, %v705_v10  ;;  %v2798_v10 = vld [vmem:[%s2561_s7 + $0x90] sm:$0xff]  }
  0x9f   : > { %639 = vrot.lane.b32.xlu1 %v548_v4, %s2463_s11  ;;  %v1042_v35 = vsel %vm1038_vm5, %v1009_v29, %v742_v59  ;;  %v567_v59 = vor.u32 %v566_v51, %v562_v50  ;;  %v574_v19 = vshrl.u32 %v2798_v10, 16 }
  0xa0   : > { %v787_v18 = vpop.permute.xlu0 %786 }
  0xa1   : > { %v789_v22 = vpop.permute.xlu1 %788  ;;  %v1073_v1 = vsel %vm1071_vm6, %v1040_v32, %v787_v18  ;;  %v690_v32 = vrot.slane %v2798_v10, 1 }
  0xa2   : > { %718 = vrot.lane.b32.xlu0 %v680_v55, %s2462_s10  ;;  %v1106_v42 = vsel %vm1104_vm7, %v1073_v1, %v822_v2  ;;  %v1075_v43 = vsel %vm1071_vm6, %v1042_v35, %v789_v22  ;;  %v691_v1 = vrot.slane %v2309_v15, 1 }
  0xa3   : > { %720 = vrot.lane.b32.xlu1 %v683_v11, %s2462_s10  ;;  %v1108_v55 = vsel %vm1104_vm7, %v1075_v43, %v824_v16  ;;  %v576_v16 = vshll.u32 %v2798_v10, 16 }
  0xa4   : > { %v859_v26 = vpop.permute.xlu0 %858 }
  0xa5   : > { %v861_v31 = vpop.permute.xlu1 %860  ;;  %v1139_v44 = vsel %vm1137_vm8, %v1106_v42, %v859_v26  ;;  %v578_v20 = vrot.slane %v576_v16, 1  ;;  %v583_v26 = vrot.slane %v581_v21, 1  ;;  %v2313_v16 = vld [vmem:[%s2561_s7 + $0xb0] ss:$0 sps:$4 sm:$0x11]  }
  0xa6   : > { %755 = vrot.lane.b32.xlu0 %v2715_v48, %s2460_s8  ;;  %v1141_v56 = vsel %vm1137_vm8, %v1108_v55, %v861_v31 }
  0xa7   : > { %757 = vrot.lane.b32.xlu1 %v2740_v9, %s2460_s8  ;;  %v579_v25 = vor.u32 %v578_v20, %v574_v19 }
  0xa8   : > { %v906_v36 = vpop.permute.xlu0 %905 }
  0xa9   : > { %v908_v41 = vpop.permute.xlu1 %907  ;;  %v1172_v46 = vsel %vm1170_vm9, %v1139_v44, %v906_v36  ;;  %v584_v35 = vsel %vm428_vm1, %v579_v25, %v583_v26  ;;  %v2311_v36 = vld [vmem:[%s2561_s7 + $0xa4] ss:$0 sps:$4 sm:$0x11]   ;;  %v692_v44 = vsel %vm653_vm0, %v690_v32, %v691_v1 }
  0xaa   : > { %802 = vrot.lane.b32.xlu0 %v548_v4, %s2464_s12  ;;  %v1174_v57 = vsel %vm1170_vm9, %v1141_v56, %v908_v41  ;;  %v572_v4 = vsel %vm428_vm1, %v567_v59, %v571_v61  ;;  %v593_v51 = vshll.u32 %v2311_v36, 16  ;;  %v694_v7 = vrot.slane %v2311_v36, 1 }
  0xab   : > { %804 = vrot.lane.b32.xlu1 %v560_v37, %s2464_s12 }
  0xac   : > { %v941_v47 = vpop.permute.xlu0 %940  ;;  %v595_v61 = vrot.slane %v593_v51, 1 }
  0xad   : > { %v626_v53 = vpop.permute.xlu1 %625  ;;  %v1205_v54 = vsel %vm1203_vm10, %v1172_v46, %v941_v47 }
  0xae   : > { %837 = vrot.lane.b32.xlu0 %v683_v11, %s2461_s9  ;;  %2166 = vmatprep.mubr.msk.bf16.mxu0 %vm1256_vm11, %v1205_v54  ;;  %v978_v29 = vsel %vm972_vm3, %v2564_v0, %v626_v53 }
  0xaf   : > { %839 = vrot.lane.b32.xlu1 %v686_v45, %s2461_s9 }
  0xb0   : > { %v943_v58 = vpop.permute.xlu0 %942 }
  0xb1   : > { %v628_v62 = vpop.permute.xlu1 %627  ;;  %v1207_v63 = vsel %vm1203_vm10, %v1174_v57, %v943_v58 }
  0xb2   : > { %874 = vrot.lane.b32.xlu0 %v2740_v9, %s2465_s24  ;;  %2167 = vmatmul.mubr.msk.bf16.vlgmr.msra.gmra.mrb[0].mxu0 %vm1256_vm11, %v1207_v63  ;;  %v980_v40 = vsel %vm972_vm3, %v2593_v30, %v628_v62 }
  0xb3   : > { %876 = vrot.lane.b32.xlu1 %v2758_v28, %s2465_s24 }
  0xb4   : > { %v707_v2 = vpop.permute.xlu0 %706 }
  0xb5   : > { %v709_v5 = vpop.permute.xlu1 %708  ;;  %v1011_v31 = vsel %vm1005_vm4, %v978_v29, %v707_v2  ;;  %v2869_v29 = vld [vmem:[%s2561_s7 + $0xb4] sm:$0xff]  }
  0xb6   : > { %921 = vrot.lane.b32.xlu0 %v560_v37, %s2466_s30  ;;  %v1013_v42 = vsel %vm1005_vm4, %v980_v40, %v709_v5 }
  0xb7   : > { %923 = vrot.lane.b32.xlu1 %v572_v4, %s2466_s30 }
  0xb8   : > { %v744_v8 = vpop.permute.xlu0 %743 }
  0xb9   : > { %v746_v11 = vpop.permute.xlu1 %745  ;;  %v1044_v33 = vsel %vm1038_vm5, %v1011_v31, %v744_v8 }
  0xba   : > { %956 = vrot.lane.b32.xlu0 %v686_v45, %s2467_s13  ;;  %v1046_v46 = vsel %vm1038_vm5, %v1013_v42, %v746_v11  ;;  %v2856_v11 = vld [vmem:[%s2561_s7 + $0xa8] sm:$0xff]  }
  0xbb   : > { %641 = vrot.lane.b32.xlu1 %v560_v37, %s2463_s11  ;;  %v588_v37 = vshll.u32 %v2811_v27, 16  ;;  %v598_v20 = vshrl.u32 %v2856_v11, 16 }
  0xbc   : > { %v791_v13 = vpop.permute.xlu0 %790 }
  0xbd   : > { %v793_v17 = vpop.permute.xlu1 %792  ;;  %v1077_v0 = vsel %vm1071_vm6, %v1044_v33, %v791_v13  ;;  %v590_v30 = vrot.slane %v588_v37, 1  ;;  %v695_v13 = vsel %vm653_vm0, %v693_v6, %v694_v7  ;;  %v696_v33 = vrot.slane %v2856_v11, 1 }
  0xbe   : > { %958 = vrot.lane.b32.xlu0 %v689_v12, %s2467_s13  ;;  %v1079_v52 = vsel %vm1071_vm6, %v1046_v46, %v793_v17  ;;  %v600_v17 = vshll.u32 %v2856_v11, 16  ;;  %v610_v46 = vshrl.u32 %v2869_v29, 16  ;;  %v699_v6 = vrot.slane %v2869_v29, 1 }
  0xbf   : > { %643 = vrot.lane.b32.xlu1 %v572_v4, %s2463_s11 }
  0xc0   : > { %v826_v18 = vpop.permute.xlu0 %825  ;;  %v602_v21 = vrot.slane %v600_v17, 1  ;;  %v2317_v17 = vld [vmem:[%s2561_s7 + $0xc8] ss:$0 sps:$4 sm:$0x11]  }
  0xc1   : > { %v828_v22 = vpop.permute.xlu1 %827  ;;  %v1110_v41 = vsel %vm1104_vm7, %v1077_v0, %v826_v18  ;;  %v2315_v0 = vld [vmem:[%s2561_s7 + $0xbc] ss:$0 sps:$4 sm:$0x11]  }
  0xc2   : > { %722 = vrot.lane.b32.xlu0 %v686_v45, %s2462_s10  ;;  %v586_v45 = vshrl.u32 %v2811_v27, 16  ;;  %v1112_v55 = vsel %vm1104_vm7, %v1079_v52, %v828_v22  ;;  %v605_v22 = vshll.u32 %v2313_v16, 16  ;;  %v603_v26 = vor.u32 %v602_v21, %v598_v20 }
  0xc3   : > { %724 = vrot.lane.b32.xlu1 %v689_v12, %s2462_s10  ;;  %v617_v51 = vshll.u32 %v2315_v0, 16  ;;  %v700_v7 = vrot.slane %v2315_v0, 1 }
  0xc4   : > { %v863_v24 = vpop.permute.xlu0 %862  ;;  %v591_v59 = vor.u32 %v590_v30, %v586_v45 }
  0xc5   : > { %v865_v3 = vpop.permute.xlu1 %864  ;;  %v1143_v43 = vsel %vm1137_vm8, %v1110_v41, %v863_v24 }
  0xc6   : > { %759 = vrot.lane.b32.xlu0 %v2758_v28, %s2460_s8  ;;  %v1145_v56 = vsel %vm1137_vm8, %v1112_v55, %v865_v3  ;;  %v607_v3 = vrot.slane %v605_v22, 1 }
  0xc7   : > { %761 = vrot.lane.b32.xlu1 %v2798_v10, %s2460_s8 }
  0xc8   : > { %v910_v34 = vpop.permute.xlu0 %909  ;;  %v608_v37 = vsel %vm428_vm1, %v603_v26, %v607_v3 }
  0xc9   : > { %v912_v38 = vpop.permute.xlu1 %911  ;;  %v1176_v47 = vsel %vm1170_vm9, %v1143_v43, %v910_v34  ;;  %v697_v34 = vrot.slane %v2313_v16, 1 }
  0xca   : > { %806 = vrot.lane.b32.xlu0 %v572_v4, %s2464_s12  ;;  %v1178_v57 = vsel %vm1170_vm9, %v1145_v56, %v912_v38  ;;  %v596_v4 = vsel %vm428_vm1, %v591_v59, %v595_v61  ;;  %v612_v38 = vshll.u32 %v2869_v29, 16  ;;  %v619_v61 = vrot.slane %v617_v51, 1 }
  0xcb   : > { %808 = vrot.lane.b32.xlu1 %v584_v35, %s2464_s12  ;;  %v698_v45 = vsel %vm653_vm0, %v696_v33, %v697_v34 }
  0xcc   : > { %v945_v50 = vpop.permute.xlu0 %944 }
  0xcd   : > { %v630_v53 = vpop.permute.xlu1 %629  ;;  %v1209_v54 = vsel %vm1203_vm10, %v1176_v47, %v945_v50 }
  0xce   : > { %841 = vrot.lane.b32.xlu0 %v689_v12, %s2461_s9  ;;  %2170 = vmatprep.mubr.msk.bf16.mxu0 %vm1256_vm11, %v1209_v54  ;;  %v982_v32 = vsel %vm972_vm3, %v2623_v49, %v630_v53 }
  0xcf   : > { %843 = vrot.lane.b32.xlu1 %v692_v44, %s2461_s9 }
  0xd0   : > { %v947_v58 = vpop.permute.xlu0 %946 }
  0xd1   : > { %v632_v62 = vpop.permute.xlu1 %631  ;;  %v1211_v63 = vsel %vm1203_vm10, %v1178_v57, %v947_v58 }
  0xd2   : > { %878 = vrot.lane.b32.xlu0 %v2798_v10, %s2465_s24  ;;  %2171 = vmatmul.mubr.msk.bf16.gmra.mrb[4].mxu0 %vm1256_vm11, %v1211_v63  ;;  %v984_v41 = vsel %vm972_vm3, %v2639_v60, %v632_v62  ;;  %v614_v60 = vrot.slane %v612_v38, 1 }
  0xd3   : > { %880 = vrot.lane.b32.xlu1 %v2811_v27, %s2465_s24 }
  0xd4   : > { %v711_v2 = vpop.permute.xlu0 %710  ;;  %v615_v59 = vor.u32 %v614_v60, %v610_v46 }
  0xd5   : > { %v713_v5 = vpop.permute.xlu1 %712  ;;  %v1015_v1 = vsel %vm1005_vm4, %v982_v32, %v711_v2  ;;  %v2318_v32 = vld [vmem:[%s2561_s7 + $0xcc] sm:$0xff]  }
  0xd6   : > { %925 = vrot.lane.b32.xlu0 %v584_v35, %s2466_s30  ;;  %v1017_v43 = vsel %vm1005_vm4, %v984_v41, %v713_v5 }
  0xd7   : > { %927 = vrot.lane.b32.xlu1 %v596_v4, %s2466_s30 }
  0xd8   : > { %v748_v8 = vpop.permute.xlu0 %747 }
  0xd9   : > { %v750_v12 = vpop.permute.xlu1 %749 }
  0xda   : > { %960 = vrot.lane.b32.xlu0 %v692_v44, %s2467_s13  ;;  %v1050_v47 = vsel %vm1038_vm5, %v1017_v43, %v750_v12  ;;  %v2914_v12 = vld [vmem:[%s2561_s7 + $0xc0] sm:$0xff]  }
  0xdb   : > { %645 = vrot.lane.b32.xlu1 %v584_v35, %s2463_s11  ;;  %v1048_v35 = vsel %vm1038_vm5, %v1015_v1, %v748_v8  ;;  %v775_v21 = vshrl.u32 %v2914_v12, 16 }
  0xdc   : > { %v795_v15 = vpop.permute.xlu0 %794 }
  0xdd   : > { %v797_v18 = vpop.permute.xlu1 %796  ;;  %v1081_v49 = vsel %vm1071_vm6, %v1048_v35, %v795_v15  ;;  %v701_v15 = vsel %vm653_vm0, %v699_v6, %v700_v7  ;;  %v818_v35 = vrot.slane %v2914_v12, 1 }
  0xde   : > { %962 = vrot.lane.b32.xlu0 %v695_v13, %s2467_s13  ;;  %v1083_v52 = vsel %vm1071_vm6, %v1050_v47, %v797_v18  ;;  %v777_v18 = vshll.u32 %v2914_v12, 16  ;;  %v894_v47 = vshrl.u32 %v2318_v32, 16 }
  0xdf   : > { %647 = vrot.lane.b32.xlu1 %v596_v4, %s2463_s11 }
  0xe0   : > { %v830_v19 = vpop.permute.xlu0 %829  ;;  %v779_v22 = vrot.slane %v777_v18, 1 }
  0xe1   : > { %v832_v24 = vpop.permute.xlu1 %831  ;;  %v1114_v42 = vsel %vm1104_vm7, %v1081_v49, %v830_v19  ;;  %v2319_v49 = vld [vmem:[%s2561_s7 + $0xd4] ss:$0 sps:$4 sm:$0x11]   ;;  %s3029_s7 = sand.u32 1, %s2442_s16  }
  0xe2   : > { %726 = vrot.lane.b32.xlu0 %v692_v44, %s2462_s10  ;;  %v1116_v55 = vsel %vm1104_vm7, %v1083_v52, %v832_v24  ;;  %v782_v24 = vshll.u32 %v2317_v17, 16  ;;  %v780_v3 = vor.u32 %v779_v22, %v775_v21  ;;  %v938_v6 = vrot.slane %v2319_v49, 1  ;;  %s1723_s29 = scalar_lea.sflag [#allocation3], %s3029_s7 }
  0xe3   : > { %728 = vrot.lane.b32.xlu1 %v695_v13, %s2462_s10 }
  0xe4   : > { %v867_v25 = vpop.permute.xlu0 %866 }
  0xe5   : > { %v869_v31 = vpop.permute.xlu1 %868  ;;  %v1147_v44 = vsel %vm1137_vm8, %v1114_v42, %v867_v25 }
  0xe6   : > { %763 = vrot.lane.b32.xlu0 %v2811_v27, %s2460_s8  ;;  %v1149_v56 = vsel %vm1137_vm8, %v1116_v55, %v869_v31  ;;  %v784_v31 = vrot.slane %v782_v24, 1 }
  0xe7   : > { %765 = vrot.lane.b32.xlu1 %v2856_v11, %s2460_s8 }
  0xe8   : > { %v914_v36 = vpop.permute.xlu0 %913  ;;  %v785_v38 = vsel %vm428_vm1, %v780_v3, %v784_v31 }
  0xe9   : > { %v916_v40 = vpop.permute.xlu1 %915  ;;  %v1180_v50 = vsel %vm1170_vm9, %v1147_v44, %v914_v36  ;;  %v819_v36 = vrot.slane %v2317_v17, 1 }
  0xea   : > { %810 = vrot.lane.b32.xlu0 %v596_v4, %s2464_s12  ;;  %v1182_v57 = vsel %vm1170_vm9, %v1149_v56, %v916_v40  ;;  %v620_v4 = vsel %vm428_vm1, %v615_v59, %v619_v61  ;;  %v896_v40 = vshll.u32 %v2318_v32, 16 }
  0xeb   : > { %812 = vrot.lane.b32.xlu1 %v608_v37, %s2464_s12  ;;  %v820_v46 = vsel %vm653_vm0, %v818_v35, %v819_v36 }
  0xec   : > { %v949_v30 = vpop.permute.xlu0 %948  ;;  %v898_v51 = vrot.slane %v896_v40, 1 }
  0xed   : > { %v634_v53 = vpop.permute.xlu1 %633  ;;  %v1213_v54 = vsel %vm1203_vm10, %v1180_v50, %v949_v30 }
  0xee   : > { %845 = vrot.lane.b32.xlu0 %v695_v13, %s2461_s9  ;;  %2174 = vmatprep.mubr.msk.bf16.mxu0 %vm1256_vm11, %v1213_v54  ;;  %v986_v33 = vsel %vm972_vm3, %v2664_v14, %v634_v53  ;;  %v899_v59 = vor.u32 %v898_v51, %v894_v47 }
  0xef   : > { %847 = vrot.lane.b32.xlu1 %v698_v45, %s2461_s9 }
  0xf0   : > { %v951_v58 = vpop.permute.xlu0 %950 }
  0xf1   : > { %v636_v62 = vpop.permute.xlu1 %635  ;;  %v1215_v63 = vsel %vm1203_vm10, %v1182_v57, %v951_v58 }
  0xf2   : > { %882 = vrot.lane.b32.xlu0 %v2856_v11, %s2465_s24  ;;  %2175 = vmatmul.mubr.msk.bf16.gmra.mrb[8].mxu0 %vm1256_vm11, %v1215_v63  ;;  %v988_v42 = vsel %vm972_vm3, %v2677_v23, %v636_v62  ;;  %v901_v23 = vshll.u32 %v2319_v49, 16 }
  0xf3   : > { %884 = vrot.lane.b32.xlu1 %v2869_v29, %s2465_s24 }
  0xf4   : > { %v715_v2 = vpop.permute.xlu0 %714  ;;  %v903_v61 = vrot.slane %v901_v23, 1 }
  0xf5   : > { %v717_v5 = vpop.permute.xlu1 %716  ;;  %v1019_v34 = vsel %vm1005_vm4, %v986_v33, %v715_v2 }
  0xf6   : > { %929 = vrot.lane.b32.xlu0 %v608_v37, %s2466_s30  ;;  %v1021_v44 = vsel %vm1005_vm4, %v988_v42, %v717_v5  ;;  %v937_v5 = vrot.slane %v2318_v32, 1 }
  0xf7   : > { %931 = vrot.lane.b32.xlu1 %v620_v4, %s2466_s30 }
  0xf8   : > { %v752_v8 = vpop.permute.xlu0 %751 }
  0xf9   : > { %v754_v13 = vpop.permute.xlu1 %753 }
  0xfa   : > { %964 = vrot.lane.b32.xlu0 %v698_v45, %s2467_s13  ;;  %v1054_v50 = vsel %vm1038_vm5, %v1021_v44, %v754_v13  ;;  %v939_v13 = vsel %vm653_vm0, %v937_v5, %v938_v6 }
  0xfb   : > { %649 = vrot.lane.b32.xlu1 %v608_v37, %s2463_s11  ;;  %v1052_v37 = vsel %vm1038_vm5, %v1019_v34, %v752_v8 }
  0xfc   : > { %v799_v16 = vpop.permute.xlu0 %798 }
  0xfd   : > { %v801_v19 = vpop.permute.xlu1 %800  ;;  %v1085_v14 = vsel %vm1071_vm6, %v1052_v37, %v799_v16 }
  0xfe   : > { %966 = vrot.lane.b32.xlu0 %v701_v15, %s2467_s13  ;;  %v1087_v52 = vsel %vm1071_vm6, %v1054_v50, %v801_v19 }
  0xff   : > { %651 = vrot.lane.b32.xlu1 %v620_v4, %s2463_s11 }
 0x100   : > { %v834_v20 = vpop.permute.xlu0 %833 }
 0x101   : > { %v836_v25 = vpop.permute.xlu1 %835  ;;  %v1118_v43 = vsel %vm1104_vm7, %v1085_v14, %v834_v20 }
 0x102   : > { %730 = vrot.lane.b32.xlu0 %v698_v45, %s2462_s10  ;;  %v1120_v55 = vsel %vm1104_vm7, %v1087_v52, %v836_v25 }
 0x103   : > { %732 = vrot.lane.b32.xlu1 %v701_v15, %s2462_s10  ;;  %s2045_s10 = sshll.u32 %s2450_s18, 11 }
 0x104   : > { %v871_v26 = vpop.permute.xlu0 %870  ;;  %s3073_s26 = scalar_lea.hbm %s3202_s2, %s2045_s10 }
 0x105   : > { %v873_v1 = vpop.permute.xlu1 %872  ;;  %v1151_v45 = vsel %vm1137_vm8, %v1118_v43, %v871_v26 }
 0x106   : > { %767 = vrot.lane.b32.xlu0 %v2869_v29, %s2460_s8  ;;  %v1153_v56 = vsel %vm1137_vm8, %v1120_v55, %v873_v1 }
 0x107   : > { %769 = vrot.lane.b32.xlu1 %v2914_v12, %s2460_s8  ;;  %s1917_s8 = sshll.u32 %s3029_s7, 7 }
 0x108   : > { %v918_v0 = vpop.permute.xlu0 %917 }
 0x109   : > { %v920_v41 = vpop.permute.xlu1 %919  ;;  %v1184_v30 = vsel %vm1170_vm9, %v1151_v45, %v918_v0 }
 0x10a   : > { %814 = vrot.lane.b32.xlu0 %v620_v4, %s2464_s12  ;;  %v1186_v57 = vsel %vm1170_vm9, %v1153_v56, %v920_v41  ;;  %v904_v4 = vsel %vm428_vm1, %v899_v59, %v903_v61 }
 0x10b   : > { %816 = vrot.lane.b32.xlu1 %v785_v38, %s2464_s12 }
 0x10c   : > { %v953_v60 = vpop.permute.xlu0 %952 }
 0x10d   : > { %v638_v53 = vpop.permute.xlu1 %637  ;;  %v1217_v54 = vsel %vm1203_vm10, %v1184_v30, %v953_v60 }
 0x10e   : > { %849 = vrot.lane.b32.xlu0 %v701_v15, %s2461_s9  ;;  %2178 = vmatprep.mubr.msk.bf16.mxu0 %vm1256_vm11, %v1217_v54  ;;  %v990_v21 = vsel %vm972_vm3, %v2702_v39, %v638_v53 }
 0x10f   : > { %851 = vrot.lane.b32.xlu1 %v820_v46, %s2461_s9  ;;  %s3044_s9 = scalar_lea.vmem [#allocation2], %s1917_s8 }
 0x110   : > { %v955_v58 = vpop.permute.xlu0 %954  ;;  %s1747_s12 = sshll.u32 %s3044_s9, 4  ;;  %s3075_s12 = int_to_ptr.vmem [resolvable:$true] %s1747_s12 }
 0x111   : > { %v640_v62 = vpop.permute.xlu1 %639  ;;  %v1219_v63 = vsel %vm1203_vm10, %v1186_v57, %v955_v58  ;;  %p2327_p1 = scmp.lt.s32.totalorder %s3075_s12, %s2325_s6 }
 0x112   : > { %886 = vrot.lane.b32.xlu0 %v2914_v12, %s2465_s24  ;;  %2179 = vmatmul.mubr.msk.bf16.gmra.mrb[12].mxu0 %vm1256_vm11, %v1219_v63  ;;  %v992_v31 = vsel %vm972_vm3, %v2715_v48, %v640_v62 }
 0x113   : > { %888 = vrot.lane.b32.xlu1 %v2318_v32, %s2465_s24 }
 0x114   : > { %v719_v2 = vpop.permute.xlu0 %718 }
 0x115   : > { %v721_v7 = vpop.permute.xlu1 %720  ;;  %v1023_v22 = vsel %vm1005_vm4, %v990_v21, %v719_v2 }
 0x116   : > { %933 = vrot.lane.b32.xlu0 %v785_v38, %s2466_s30  ;;  %v1025_v1 = vsel %vm1005_vm4, %v992_v31, %v721_v7 }
 0x117   : > { %935 = vrot.lane.b32.xlu1 %v904_v4, %s2466_s30  ;;  %s2320_s30 = scalar_lea.vmem %s3075_s12, 2048 }
 0x118   : > { %v756_v8 = vpop.permute.xlu0 %755  ;;  %p2321_p12 = scmp.ne.s32.totalorder %s3075_s12, %s2320_s30 }
 0x119   : > { %v758_v15 = vpop.permute.xlu1 %757  ;;  %v1056_v24 = vsel %vm1038_vm5, %v1023_v22, %v756_v8 }
 0x11a   : > { %968 = vrot.lane.b32.xlu0 %v820_v46, %s2467_s13  ;;  %v1058_v34 = vsel %vm1038_vm5, %v1025_v1, %v758_v15  ;;  %p2322_p13 = pnand %p2321_p12, %p2539_p4 }
 0x11b   : > { %970 = vrot.lane.b32.xlu1 %v939_v13, %s2467_s13  ;;  %s2326_s13 = scalar_lea.vmem %s2325_s6, 4096 }
 0x11c   : > { %v803_v12 = vpop.permute.xlu0 %802  ;;  %p2323_p0 = pneg %p2322_p13  ;;  %p2328_p2 = scmp.lt.s32.totalorder %s2326_s13, %s2320_s30 }
 0x11d   : > { %v805_v16 = vpop.permute.xlu1 %804  ;;  %v1089_v26 = vsel %vm1071_vm6, %v1056_v24, %v803_v12 }
 0x11e   : > { %v1091_v36 = vsel %vm1071_vm6, %v1058_v34, %v805_v16  ;;  %p2329_p3 = por %p2328_p2, %p2327_p1 }
 0x120   : > { %v838_v17 = vpop.permute.xlu0 %837  ;;  %p2330_p5 = pnand %p2329_p3, %p2323_p0 }
 0x121   : > { %v840_v18 = vpop.permute.xlu1 %839  ;;  %v1122_v32 = vsel %vm1104_vm7, %v1089_v26, %v838_v17 }
 0x122   : > { %v1124_v38 = vsel %vm1104_vm7, %v1091_v36, %v840_v18 }
 0x124   : > { %v875_v19 = vpop.permute.xlu0 %874 }
 0x125   : > { %v877_v20 = vpop.permute.xlu1 %876  ;;  %v1155_v33 = vsel %vm1137_vm8, %v1122_v32, %v875_v19 }
 0x126   : > { %v1157_v48 = vsel %vm1137_vm8, %v1124_v38, %v877_v20 }
 0x128   : > { %v922_v25 = vpop.permute.xlu0 %921 }
 0x129   : > { %v924_v3 = vpop.permute.xlu1 %923  ;;  %v1188_v39 = vsel %vm1170_vm9, %v1155_v33, %v922_v25 }
 0x12a   : > { %v1190_v49 = vsel %vm1170_vm9, %v1157_v48, %v924_v3 }
 0x12c   : > { %v957_v35 = vpop.permute.xlu0 %956 }
 0x12d   : > { %v642_v37 = vpop.permute.xlu1 %641  ;;  %v1221_v0 = vsel %vm1203_vm10, %v1188_v39, %v957_v35 }
 0x12e   : > { %2182 = vmatprep.mubr.msk.bf16.mxu1 %vm1256_vm11, %v1221_v0  ;;  %v994_v23 = vsel %vm972_vm3, %v2740_v9, %v642_v37 }
 0x130   : > { %v959_v40 = vpop.permute.xlu0 %958 }
 0x131   : > { %v644_v14 = vpop.permute.xlu1 %643  ;;  %v1223_v41 = vsel %vm1203_vm10, %v1190_v49, %v959_v40 }
 0x132   : > { %2183 = vmatmul.mubr.msk.bf16.vlgmr.msra.gmra.mrb[0].mxu1 %vm1256_vm11, %v1223_v41  ;;  %v996_v57 = vsel %vm972_vm3, %v2758_v28, %v644_v14 }
 0x134   : > { %v723_v42 = vpop.permute.xlu0 %722 }
 0x135   : > { %v725_v43 = vpop.permute.xlu1 %724  ;;  %v1027_v52 = vsel %vm1005_vm4, %v994_v23, %v723_v42 }
 0x136   : > { %v1029_v59 = vsel %vm1005_vm4, %v996_v57, %v725_v43 }
 0x138   : > { %v760_v44 = vpop.permute.xlu0 %759 }
 0x139   : > { %v762_v45 = vpop.permute.xlu1 %761  ;;  %v1060_v53 = vsel %vm1038_vm5, %v1027_v52, %v760_v44 }
 0x13a   : > { %v1062_v62 = vsel %vm1038_vm5, %v1029_v59, %v762_v45 }
 0x13c   : > { %v807_v46 = vpop.permute.xlu0 %806 }
 0x13d   : > { %v809_v47 = vpop.permute.xlu1 %808  ;;  %v1093_v55 = vsel %vm1071_vm6, %v1060_v53, %v807_v46 }
 0x13e   : > { %v1095_v2 = vsel %vm1071_vm6, %v1062_v62, %v809_v47 }
 0x140   : > { %v842_v50 = vpop.permute.xlu0 %841 }
 0x141   : > { %v844_v30 = vpop.permute.xlu1 %843  ;;  %v1126_v58 = vsel %vm1104_vm7, %v1093_v55, %v842_v50 }
 0x142   : > { %v1128_v6 = vsel %vm1104_vm7, %v1095_v2, %v844_v30 }
 0x144   : > { %v879_v60 = vpop.permute.xlu0 %878 }
 0x145   : > { %v881_v51 = vpop.permute.xlu1 %880  ;;  %v1159_v61 = vsel %vm1137_vm8, %v1126_v58, %v879_v60 }
 0x146   : > { %v1161_v28 = vsel %vm1137_vm8, %v1128_v6, %v881_v51 }
 0x148   : > { %v926_v54 = vpop.permute.xlu0 %925 }
 0x149   : > { %v928_v56 = vpop.permute.xlu1 %927  ;;  %v1192_v9 = vsel %vm1170_vm9, %v1159_v61, %v926_v54 }
 0x14a   : > { %v1194_v7 = vsel %vm1170_vm9, %v1161_v28, %v928_v56 }
 0x14c   : > { %v961_v63 = vpop.permute.xlu0 %960 }
 0x14d   : > { %v646_v4 = vpop.permute.xlu1 %645  ;;  %v1225_v5 = vsel %vm1203_vm10, %v1192_v9, %v961_v63 }
 0x14e   : > { %2186 = vmatprep.mubr.msk.bf16.mxu1 %vm1256_vm11, %v1225_v5  ;;  %v998_v26 = vsel %vm972_vm3, %v2798_v10, %v646_v4 }
 0x150   : > { %v963_v8 = vpop.permute.xlu0 %962 }
 0x151   : > { %v648_v13 = vpop.permute.xlu1 %647  ;;  %v1227_v15 = vsel %vm1203_vm10, %v1194_v7, %v963_v8 }
 0x152   : > { %2187 = vmatmul.mubr.msk.bf16.gmra.mrb[4].mxu1 %vm1256_vm11, %v1227_v15  ;;  %v1000_v34 = vsel %vm972_vm3, %v2811_v27, %v648_v13 }
 0x154   : > { %v727_v12 = vpop.permute.xlu0 %726 }
 0x155   : > { %v729_v16 = vpop.permute.xlu1 %728  ;;  %v1031_v3 = vsel %vm1005_vm4, %v998_v26, %v727_v12 }
 0x156   : > { %v1033_v35 = vsel %vm1005_vm4, %v1000_v34, %v729_v16 }
 0x158   : > { %v764_v17 = vpop.permute.xlu0 %763 }
 0x159   : > { %v766_v18 = vpop.permute.xlu1 %765  ;;  %v1064_v31 = vsel %vm1038_vm5, %v1031_v3, %v764_v17 }
 0x15a   : > { %v1066_v37 = vsel %vm1038_vm5, %v1033_v35, %v766_v18 }
 0x15c   : > { %v811_v19 = vpop.permute.xlu0 %810 }
 0x15d   : > { %v813_v20 = vpop.permute.xlu1 %812  ;;  %v1097_v1 = vsel %vm1071_vm6, %v1064_v31, %v811_v19 }
 0x15e   : > { %v1099_v38 = vsel %vm1071_vm6, %v1066_v37, %v813_v20 }
 0x160   : > { %v846_v21 = vpop.permute.xlu0 %845 }
 0x161   : > { %v848_v22 = vpop.permute.xlu1 %847  ;;  %v1130_v39 = vsel %vm1104_vm7, %v1097_v1, %v846_v21 }
 0x162   : > { %v1132_v40 = vsel %vm1104_vm7, %v1099_v38, %v848_v22 }
 0x164   : > { %v883_v24 = vpop.permute.xlu0 %882 }
 0x165   : > { %v885_v25 = vpop.permute.xlu1 %884  ;;  %v1163_v36 = vsel %vm1137_vm8, %v1130_v39, %v883_v24 }
 0x166   : > { %v1165_v27 = vsel %vm1137_vm8, %v1132_v40, %v885_v25 }
 0x168   : > { %v930_v32 = vpop.permute.xlu0 %929 }
 0x169   : > { %v932_v33 = vpop.permute.xlu1 %931  ;;  %v1196_v10 = vsel %vm1170_vm9, %v1163_v36, %v930_v32 }
 0x16a   : > { %v1198_v14 = vsel %vm1170_vm9, %v1165_v27, %v932_v33 }
 0x16c   : > { %v965_v0 = vpop.permute.xlu0 %964 }
 0x16d   : > { %v650_v48 = vpop.permute.xlu1 %649  ;;  %v1229_v49 = vsel %vm1203_vm10, %v1196_v10, %v965_v0 }
 0x16e   : > { %2190 = vmatprep.mubr.msk.bf16.mxu1 %vm1256_vm11, %v1229_v49  ;;  %v1002_v52 = vsel %vm972_vm3, %v2856_v11, %v650_v48 }
 0x170   : > { %v967_v41 = vpop.permute.xlu0 %966 }
 0x171   : > { %v652_v42 = vpop.permute.xlu1 %651  ;;  %v1231_v43 = vsel %vm1203_vm10, %v1198_v14, %v967_v41 }
 0x172   : > { %2191 = vmatmul.mubr.msk.bf16.gmra.mrb[8].mxu1 %vm1256_vm11, %v1231_v43  ;;  %v1004_v53 = vsel %vm972_vm3, %v2869_v29, %v652_v42 }
 0x174   : > { %v731_v44 = vpop.permute.xlu0 %730 }
 0x175   : > { %v733_v45 = vpop.permute.xlu1 %732  ;;  %v1035_v57 = vsel %vm1005_vm4, %v1002_v52, %v731_v44 }
 0x176   : > { %v1037_v56 = vsel %vm1005_vm4, %v1004_v53, %v733_v45 }
 0x178   : > { %v768_v46 = vpop.permute.xlu0 %767 }
 0x179   : > { %v770_v47 = vpop.permute.xlu1 %769  ;;  %v1068_v61 = vsel %vm1038_vm5, %v1035_v57, %v768_v46 }
 0x17a   : > { %v1070_v59 = vsel %vm1038_vm5, %v1037_v56, %v770_v47 }
 0x17c   : > { %v815_v50 = vpop.permute.xlu0 %814 }
 0x17d   : > { %v817_v30 = vpop.permute.xlu1 %816  ;;  %v1101_v63 = vsel %vm1071_vm6, %v1068_v61, %v815_v50 }
 0x17e   : > { %v1103_v9 = vsel %vm1071_vm6, %v1070_v59, %v817_v30 }
 0x180   : > { %v850_v60 = vpop.permute.xlu0 %849 }
 0x181   : > { %v852_v51 = vpop.permute.xlu1 %851  ;;  %v1134_v13 = vsel %vm1104_vm7, %v1101_v63, %v850_v60 }
 0x182   : > { %v1136_v8 = vsel %vm1104_vm7, %v1103_v9, %v852_v51 }
 0x184   : > { %v887_v23 = vpop.permute.xlu0 %886 }
 0x185   : > { %v889_v54 = vpop.permute.xlu1 %888  ;;  %v2168_v55 = vpop.f32.mrb[0].mxu0  ;;  %v1167_v15 = vsel %vm1137_vm8, %v1134_v13, %v887_v23 }
 0x186   : > { %v1327_v58 = vpop.f32.mrb[1].mxu0  ;;  %v1654_v12 = vmul.f32 %v2168_v55, %v2168_v55  ;;  %v1169_v18 = vsel %vm1137_vm8, %v1136_v8, %v889_v54 }
 0x187   : > { %v2169_v62 = vpop.f32.mrb[2].mxu0  ;;  %v1652_v29 = vmul.f32 %v1327_v58, %v1327_v58 }
 0x188   : > { %v2054_v11 = vpack.c.bf16 %v2169_v62, %v2168_v55  ;;  %v1330_v2 = vpop.f32.mrb[3].mxu0  ;;  %v934_v4 = vpop.permute.xlu0 %933  ;;  %v1655_v19 = vmul.f32 %v2169_v62, %v2169_v62 }
 0x189   : > { %v936_v5 = vpop.permute.xlu1 %935  ;;  %v2049_v6 = vpack.c.bf16 %v1330_v2, %v1327_v58  ;;  %v1614_v28 = vadd.f32 %v1330_v2, %v1327_v58  ;;  %v1653_v7 = vmul.f32 %v1330_v2, %v1330_v2  ;;  %v1200_v20 = vsel %vm1170_vm9, %v1167_v15, %v934_v4 }
 0x18a   : > { %2126 = vst [vmem:[%s3044_s9 + $0x8] sm:$0xff] %v2054_v11   ;;  %v1202_v22 = vsel %vm1170_vm9, %v1169_v18, %v936_v5 }
 0x18b   : > { %2050 = vst [vmem:[%s3044_s9] sm:$0xff] %v2049_v6   ;;  %v1615_v16 = vadd.f32 %v2168_v55, %v1614_v28  ;;  %v1684_v17 = vadd.f32 %v1653_v7, %v1652_v29 }
 0x18c   : > { %v969_v21 = vpop.permute.xlu0 %968 }
 0x18d   : > { %v1685_v24 = vadd.f32 %v1684_v17, %v1654_v12  ;;  %v971_v25 = vpop.permute.xlu1 %970  ;;  %v1233_v26 = vsel %vm1203_vm10, %v1200_v20, %v969_v21  ;;  %v1616_v3 = vadd.f32 %v2169_v62, %v1615_v16 }
 0x18e   : > { %v1235_v31 = vsel %vm1203_vm10, %v1202_v22, %v971_v25  ;;  %2194 = vmatprep.mubr.msk.bf16.mxu1 %vm1256_vm11, %v1233_v26 }
 0x18f   : > { %2195 = vmatmul.mubr.msk.bf16.gmra.mrb[12].mxu1 %vm1256_vm11, %v1235_v31  ;;  %v1686_v32 = vadd.f32 %v1685_v24, %v1655_v19 }
 0x1a5   : > { %v2172_v1 = vpop.f32.mrb[4].mxu0 }
 0x1a6   : > { %v1343_v33 = vpop.f32.mrb[5].mxu0  ;;  %v1658_v49 = vmul.f32 %v2172_v1, %v2172_v1 }
 0x1a7   : > { %v1617_v34 = vadd.f32 %v1616_v3, %v1343_v33  ;;  %v1656_v39 = vmul.f32 %v1343_v33, %v1343_v33  ;;  %v2173_v35 = vpop.f32.mrb[6].mxu0 }
 0x1a8   : > { %v2064_v36 = vpack.c.bf16 %v2173_v35, %v2172_v1  ;;  %v1346_v37 = vpop.f32.mrb[7].mxu0  ;;  %v1659_v14 = vmul.f32 %v2173_v35, %v2173_v35 }
 0x1a9   : > { %v1687_v10 = vadd.f32 %v1686_v32, %v1656_v39  ;;  %v2059_v0 = vpack.c.bf16 %v1346_v37, %v1343_v33  ;;  %v1618_v38 = vadd.f32 %v1617_v34, %v1346_v37  ;;  %v1657_v48 = vmul.f32 %v1346_v37, %v1346_v37 }
 0x1aa   : > { %2128 = vst [vmem:[%s3044_s9 + $0x18] sm:$0xff] %v2064_v36  }
 0x1ab   : > { %2127 = vst [vmem:[%s3044_s9 + $0x10] sm:$0xff] %v2059_v0   ;;  %v1619_v40 = vadd.f32 %v2172_v1, %v1618_v38  ;;  %v1688_v27 = vadd.f32 %v1687_v10, %v1657_v48 }
 0x1ad   : > { %v1689_v41 = vadd.f32 %v1688_v27, %v1658_v49  ;;  %v1620_v42 = vadd.f32 %v2173_v35, %v1619_v40 }
 0x1af   : > { %v1690_v43 = vadd.f32 %v1689_v41, %v1659_v14 }
 0x1c5   : > { %v2176_v44 = vpop.f32.mrb[8].mxu0 }
 0x1c6   : > { %v1359_v45 = vpop.f32.mrb[9].mxu0  ;;  %v1662_v54 = vmul.f32 %v2176_v44, %v2176_v44 }
 0x1c7   : > { %v1621_v46 = vadd.f32 %v1620_v42, %v1359_v45  ;;  %v1660_v47 = vmul.f32 %v1359_v45, %v1359_v45  ;;  %v2177_v50 = vpop.f32.mrb[10].mxu0 }
 0x1c8   : > { %v2074_v30 = vpack.c.bf16 %v2177_v50, %v2176_v44  ;;  %v1362_v60 = vpop.f32.mrb[11].mxu0  ;;  %v1663_v57 = vmul.f32 %v2177_v50, %v2177_v50 }
 0x1c9   : > { %v1691_v51 = vadd.f32 %v1690_v43, %v1660_v47  ;;  %v2069_v23 = vpack.c.bf16 %v1362_v60, %v1359_v45  ;;  %v1622_v52 = vadd.f32 %v1621_v46, %v1362_v60  ;;  %v1661_v53 = vmul.f32 %v1362_v60, %v1362_v60 }
 0x1ca   : > { %2130 = vst [vmem:[%s3044_s9 + $0x28] sm:$0xff] %v2074_v30  }
 0x1cb   : > { %2129 = vst [vmem:[%s3044_s9 + $0x20] sm:$0xff] %v2069_v23   ;;  %v1623_v55 = vadd.f32 %v2176_v44, %v1622_v52  ;;  %v1692_v56 = vadd.f32 %v1691_v51, %v1661_v53 }
 0x1cd   : > { %v1693_v58 = vadd.f32 %v1692_v56, %v1662_v54  ;;  %v1624_v59 = vadd.f32 %v2177_v50, %v1623_v55 }
 0x1cf   : > { %v1694_v61 = vadd.f32 %v1693_v58, %v1663_v57 }
 0x1e5   : > { %v2180_v62 = vpop.f32.mrb[12].mxu0 }
 0x1e6   : > { %v1375_v9 = vpop.f32.mrb[13].mxu0  ;;  %v1666_v8 = vmul.f32 %v2180_v62, %v2180_v62 }
 0x1e7   : > { %v1625_v63 = vadd.f32 %v1624_v59, %v1375_v9  ;;  %v1664_v11 = vmul.f32 %v1375_v9, %v1375_v9  ;;  %v2181_v2 = vpop.f32.mrb[14].mxu0 }
 0x1e8   : > { %v2084_v4 = vpack.c.bf16 %v2181_v2, %v2180_v62  ;;  %v1378_v29 = vpop.f32.mrb[15].mxu0  ;;  %v1667_v12 = vmul.f32 %v2181_v2, %v2181_v2 }
 0x1e9   : > { %v1695_v5 = vadd.f32 %v1694_v61, %v1664_v11  ;;  %v2079_v6 = vpack.c.bf16 %v1378_v29, %v1375_v9  ;;  %v1626_v28 = vadd.f32 %v1625_v63, %v1378_v29  ;;  %v1665_v7 = vmul.f32 %v1378_v29, %v1378_v29 }
 0x1ea   : > { %2132 = vst [vmem:[%s3044_s9 + $0x38] sm:$0xff] %v2084_v4  }
 0x1eb   : > { %2131 = vst [vmem:[%s3044_s9 + $0x30] sm:$0xff] %v2079_v6   ;;  %v1627_v13 = vadd.f32 %v2180_v62, %v1626_v28  ;;  %v1696_v15 = vadd.f32 %v1695_v5, %v1665_v7 }
 0x1ed   : > { %v1697_v16 = vadd.f32 %v1696_v15, %v1666_v8  ;;  %v1628_v17 = vadd.f32 %v2181_v2, %v1627_v13 }
 0x1ef   : > { %v1698_v18 = vadd.f32 %v1697_v16, %v1667_v12 }
 0x205   : > { %v2184_v19 = vpop.f32.mrb[0].mxu1 }
 0x206   : > { %v1391_v20 = vpop.f32.mrb[1].mxu1  ;;  %v1670_v33 = vmul.f32 %v2184_v19, %v2184_v19 }
 0x207   : > { %v1629_v21 = vadd.f32 %v1628_v17, %v1391_v20  ;;  %v1668_v22 = vmul.f32 %v1391_v20, %v1391_v20  ;;  %v2185_v24 = vpop.f32.mrb[2].mxu1 }
 0x208   : > { %v2094_v25 = vpack.c.bf16 %v2185_v24, %v2184_v19  ;;  %v1394_v26 = vpop.f32.mrb[3].mxu1  ;;  %v1671_v35 = vmul.f32 %v2185_v24, %v2185_v24 }
 0x209   : > { %v1699_v3 = vadd.f32 %v1698_v18, %v1668_v22  ;;  %v2089_v31 = vpack.c.bf16 %v1394_v26, %v1391_v20  ;;  %v1630_v32 = vadd.f32 %v1629_v21, %v1394_v26  ;;  %v1669_v1 = vmul.f32 %v1394_v26, %v1394_v26 }
 0x20a   : > { %2134 = vst [vmem:[%s3044_s9 + $0x48] sm:$0xff] %v2094_v25  }
 0x20b   : > { %2133 = vst [vmem:[%s3044_s9 + $0x40] sm:$0xff] %v2089_v31   ;;  %v1631_v34 = vadd.f32 %v2184_v19, %v1630_v32  ;;  %v1700_v39 = vadd.f32 %v1699_v3, %v1669_v1 }
 0x20d   : > { %v1701_v36 = vadd.f32 %v1700_v39, %v1670_v33  ;;  %v1632_v37 = vadd.f32 %v2185_v24, %v1631_v34 }
 0x20f   : > { %v1702_v10 = vadd.f32 %v1701_v36, %v1671_v35 }
 0x225   : > { %v2188_v0 = vpop.f32.mrb[4].mxu1 }
 0x226   : > { %v1407_v38 = vpop.f32.mrb[5].mxu1  ;;  %v1674_v45 = vmul.f32 %v2188_v0, %v2188_v0 }
 0x227   : > { %v1633_v48 = vadd.f32 %v1632_v37, %v1407_v38  ;;  %v1672_v49 = vmul.f32 %v1407_v38, %v1407_v38  ;;  %v2189_v40 = vpop.f32.mrb[6].mxu1 }
 0x228   : > { %v2104_v27 = vpack.c.bf16 %v2189_v40, %v2188_v0  ;;  %v1410_v14 = vpop.f32.mrb[7].mxu1  ;;  %v1675_v50 = vmul.f32 %v2189_v40, %v2189_v40 }
 0x229   : > { %v1703_v41 = vadd.f32 %v1702_v10, %v1672_v49  ;;  %v2099_v42 = vpack.c.bf16 %v1410_v14, %v1407_v38  ;;  %v1634_v43 = vadd.f32 %v1633_v48, %v1410_v14  ;;  %v1673_v44 = vmul.f32 %v1410_v14, %v1410_v14 }
 0x22a   : > { %2136 = vst [vmem:[%s3044_s9 + $0x58] sm:$0xff] %v2104_v27  }
 0x22b   : > { %2135 = vst [vmem:[%s3044_s9 + $0x50] sm:$0xff] %v2099_v42   ;;  %v1635_v46 = vadd.f32 %v2188_v0, %v1634_v43  ;;  %v1704_v47 = vadd.f32 %v1703_v41, %v1673_v44 }
 0x22d   : > { %v1705_v30 = vadd.f32 %v1704_v47, %v1674_v45  ;;  %v1636_v60 = vadd.f32 %v2189_v40, %v1635_v46 }
 0x22f   : > { %v1706_v51 = vadd.f32 %v1705_v30, %v1675_v50 }
 0x245   : > { %v2192_v23 = vpop.f32.mrb[8].mxu1 }
 0x246   : > { %v1423_v52 = vpop.f32.mrb[9].mxu1  ;;  %v1678_v9 = vmul.f32 %v2192_v23, %v2192_v23 }
 0x247   : > { %v1637_v53 = vadd.f32 %v1636_v60, %v1423_v52  ;;  %v1676_v54 = vmul.f32 %v1423_v52, %v1423_v52  ;;  %v2193_v55 = vpop.f32.mrb[10].mxu1 }
 0x248   : > { %v2114_v56 = vpack.c.bf16 %v2193_v55, %v2192_v23  ;;  %v1426_v57 = vpop.f32.mrb[11].mxu1  ;;  %v1679_v2 = vmul.f32 %v2193_v55, %v2193_v55 }
 0x249   : > { %v1707_v58 = vadd.f32 %v1706_v51, %v1676_v54  ;;  %v2109_v59 = vpack.c.bf16 %v1426_v57, %v1423_v52  ;;  %v1638_v61 = vadd.f32 %v1637_v53, %v1426_v57  ;;  %v1677_v62 = vmul.f32 %v1426_v57, %v1426_v57 }
 0x24a   : > { %2138 = vst [vmem:[%s3044_s9 + $0x68] sm:$0xff] %v2114_v56  }
 0x24b   : > { %2137 = vst [vmem:[%s3044_s9 + $0x60] sm:$0xff] %v2109_v59   ;;  %v1639_v63 = vadd.f32 %v2192_v23, %v1638_v61  ;;  %v1708_v11 = vadd.f32 %v1707_v58, %v1677_v62 }
 0x24d   : > { %v1709_v4 = vadd.f32 %v1708_v11, %v1678_v9  ;;  %v1640_v29 = vadd.f32 %v2193_v55, %v1639_v63 }
 0x24f   : > { %v1710_v5 = vadd.f32 %v1709_v4, %v1679_v2 }
 0x262   : > { %v2196_v6 = vpop.f32.mrb[12].mxu1 }
 0x263   : > { %v1439_v28 = vpop.f32.mrb[13].mxu1  ;;  %v1682_v20 = vmul.f32 %v2196_v6, %v2196_v6 }
 0x264   : > { %v1641_v7 = vadd.f32 %v1640_v29, %v1439_v28  ;;  %v1680_v8 = vmul.f32 %v1439_v28, %v1439_v28  ;;  %v2197_v13 = vpop.f32.mrb[14].mxu1 }
 0x265   : > { %v2124_v15 = vpack.c.bf16 %v2197_v13, %v2196_v6  ;;  %v1442_v12 = vpop.f32.mrb[15].mxu1 }
 0x266   : > { %v1711_v16 = vadd.f32 %v1710_v5, %v1680_v8  ;;  %v2119_v17 = vpack.c.bf16 %v1442_v12, %v1439_v28  ;;  %v1642_v18 = vadd.f32 %v1641_v7, %v1442_v12  ;;  %v1681_v19 = vmul.f32 %v1442_v12, %v1442_v12 }
 0x267   : > { %2140 = vst [vmem:[%s3044_s9 + $0x78] sm:$0xff] %v2124_v15  }
 0x268   : > { %2139 = vst [vmem:[%s3044_s9 + $0x70] sm:$0xff] %v2119_v17   ;;  %v1643_v21 = vadd.f32 %v2196_v6, %v1642_v18  ;;  %v1712_v22 = vadd.f32 %v1711_v16, %v1681_v19 }
 0x269   : > { %2333 = shalt.err (!%p2330_p5)
}
 0x26a   : > { %s2334_s8 = scalar_lea.hbm %s3073_s26, 2048  ;;  %s2338_s14 = scalar_lea.hbm %s3202_s2, 4096 }
 0x26b   : > { %p2335_p6 = scmp.ne.s32.totalorder %s3073_s26, %s2334_s8  ;;  %p2339_p10 = scmp.lt.u32.totalorder %s3073_s26, %s3202_s2 }
 0x26c   : > { %p2340_p11 = scmp.lt.u32.totalorder %s2338_s14, %s2334_s8  ;;  %p2342_p13 = scmp.lt.u32.totalorder %s2334_s8, %s3073_s26 }
 0x26d   : > { %p2336_p7 = pnand %p2335_p6, %p2539_p4 }
 0x26e   : > { %p2341_p12 = por %p2340_p11, %p2339_p10 }
 0x26f   : > { %p2337_p9 = pneg %p2336_p7 }
 0x270   : > { %p2343_p0 = por %p2342_p13, %p2341_p12 }
 0x272   : > { %p2344_p1 = pnand %p2343_p0, %p2337_p9 }
 0x274   : > { %2347 = shalt.err (!%p2344_p1)
}
 0x275   : > { %s2469_s30 = smov 64   ;;  %v1683_v24 = vmul.f32 %v2197_v13, %v2197_v13  ;;  %v1644_v25 = vadd.f32 %v2197_v13, %v1643_v21  ;;  %v1713_v26 = vadd.f32 %v1712_v22, %v1682_v20  ;;  %s3106_s6 = sand.u32 1, %s1912_s21  }
 0x276   : > { %2207 = dma.vmem_to_hbm [thread:$0]  (%p2539_p4), %s3075_s12, 2048, %s3073_s26, %s1723_s29, %s2469_s30, %s2469_s30, %s2463_s11  }
 0x277   : > { %v1645_v3 = vrot.slane %v1644_v25, 4  ;;  %v1714_v31 = vadd.f32 %v1713_v26, %v1683_v24  ;;  %s2009_s13 = sshll.u32 %s2450_s18, 4  ;;  %s228_s8 = scalar_lea.vmem [#allocation4], %s3029_s7 }
 0x278   : > { %s1764_s11 = sshll.u32 %s228_s8, 4  ;;  %s234_s12 = scalar_lea.vmem [#allocation6], %s3029_s7  ;;  %s3118_s11 = int_to_ptr.vmem [resolvable:$true] %s1764_s11 }
 0x279   : > { %v1646_v32 = vadd.f32 %v1645_v3, %v1644_v25  ;;  %v1715_v1 = vrot.slane %v1714_v31, 4  ;;  %s1778_s26 = sshll.u32 %s234_s12, 4  ;;  %s3116_s10 = scalar_lea.hbm %s3203_s3, %s2009_s13  ;;  %s3125_s26 = int_to_ptr.vmem [resolvable:$true] %s1778_s26 }
 0x27a   : > { %s3123_s14 = scalar_lea.hbm %s3204_s4, %s2009_s13  ;;  %s1728_s24 = scalar_lea.sflag [#allocation5], %s3106_s6 }
 0x27b   : > { %v1716_v33 = vadd.f32 %v1715_v1, %v1714_v31  ;;  %v1647_v34 = vrot.slane %v1646_v32, 2  ;;  %s2348_s5 = scalar_lea.vmem %s3118_s11, 16  ;;  %s2470_s30 = smov [#allocation4]  }
 0x27c   : > { %p2349_p2 = scmp.ne.s32.totalorder %s3118_s11, %s2348_s5  ;;  %s2352_s29 = sshll.u32 %s2470_s30, 4  ;;  %s2353_s29 = int_to_ptr.vmem [resolvable:$false] %s2352_s29 }
 0x27d   : > { %v1648_v39 = vadd.f32 %v1647_v34, %v1646_v32  ;;  %v1717_v35 = vrot.slane %v1716_v33, 2  ;;  %s2354_s9 = scalar_lea.vmem %s2353_s29, 32  ;;  %p2355_p6 = scmp.lt.s32.totalorder %s3118_s11, %s2353_s29 }
 0x27e   : > { %p2350_p3 = pnand %p2349_p2, %p2539_p4  ;;  %p2356_p7 = scmp.lt.s32.totalorder %s2354_s9, %s2348_s5 }
 0x27f   : > { %v1649_v36 = vrot.slane %v1648_v39, 1  ;;  %v1718_v37 = vadd.f32 %v1717_v35, %v1716_v33 }
 0x280   : > { %p2351_p5 = pneg %p2350_p3  ;;  %p2357_p9 = por %p2356_p7, %p2355_p6 }
 0x281   : > { %v1650_v10 = vadd.f32 %v1649_v36, %v1648_v39  ;;  %v1719_v0 = vrot.slane %v1718_v37, 1 }
 0x282   : > { %p2358_p10 = pnand %p2357_p9, %p2351_p5 }
 0x283   : > { %1651 = vst [vmem:[%s228_s8] sm:$0x1] %v1650_v10  ;;  %v1720_v38 = vadd.f32 %v1719_v0, %v1718_v37 }
 0x284   : > { %2361 = shalt.err (!%p2358_p10)
}
 0x285   : > { %s2362_s13 = scalar_lea.hbm %s3116_s10, 16  ;;  %s2366_s21 = scalar_lea.hbm %s3203_s3, 32 }
 0x286   : > { %p2363_p11 = scmp.ne.s32.totalorder %s3116_s10, %s2362_s13  ;;  %p2367_p0 = scmp.lt.u32.totalorder %s3116_s10, %s3203_s3 }
 0x287   : > { %p2368_p1 = scmp.lt.u32.totalorder %s2366_s21, %s2362_s13  ;;  %p2370_p3 = scmp.lt.u32.totalorder %s2362_s13, %s3116_s10 }
 0x288   : > { %p2364_p12 = pnand %p2363_p11, %p2539_p4 }
 0x289   : > { %p2369_p2 = por %p2368_p1, %p2367_p0 }
 0x28a   : > { %p2365_p13 = pneg %p2364_p12 }
 0x28b   : > { %p2371_p5 = por %p2370_p3, %p2369_p2 }
 0x28d   : > { %p2372_p6 = pnand %p2371_p5, %p2365_p13 }
 0x28f   : > { %2375 = shalt.err (!%p2372_p6)
}
 0x290   : > { %2208 = dma.vmem_to_hbm [thread:$0]  (%p2539_p4), %s3118_s11, 16, %s3116_s10, %s1728_s24   ;;  %1721 = vst [vmem:[%s234_s12] sm:$0x1] %v1720_v38 }
 0x291   : > { %s2376_s5 = scalar_lea.vmem %s3125_s26, 16  ;;  %s2471_s9 = smov [#allocation6]  }
 0x292   : > { %p2377_p7 = scmp.ne.s32.totalorder %s3125_s26, %s2376_s5  ;;  %s2380_s13 = sshll.u32 %s2471_s9, 4  ;;  %s2381_s13 = int_to_ptr.vmem [resolvable:$false] %s2380_s13 }
 0x293   : > { %s2382_s8 = scalar_lea.vmem %s2381_s13, 32  ;;  %p2383_p11 = scmp.lt.s32.totalorder %s3125_s26, %s2381_s13 }
 0x294   : > { %p2378_p9 = pnand %p2377_p7, %p2539_p4  ;;  %p2384_p12 = scmp.lt.s32.totalorder %s2382_s8, %s2376_s5 }
 0x296   : > { %p2379_p10 = pneg %p2378_p9  ;;  %p2385_p13 = por %p2384_p12, %p2383_p11 }
 0x298   : > { %p2386_p0 = pnand %p2385_p13, %p2379_p10 }
 0x29a   : > { %2389 = shalt.err (!%p2386_p0)
}
 0x29b   : > { %s2390_s7 = scalar_lea.hbm %s3123_s14, 16  ;;  %s2394_s10 = scalar_lea.hbm %s3204_s4, 32 }
 0x29c   : > { %p2391_p1 = scmp.ne.s32.totalorder %s3123_s14, %s2390_s7  ;;  %p2395_p5 = scmp.lt.u32.totalorder %s3123_s14, %s3204_s4 }
 0x29d   : > { %p2396_p6 = scmp.lt.u32.totalorder %s2394_s10, %s2390_s7  ;;  %p2398_p9 = scmp.lt.u32.totalorder %s2390_s7, %s3123_s14 }
 0x29e   : > { %p2392_p2 = pnand %p2391_p1, %p2539_p4 }
 0x29f   : > { %p2397_p7 = por %p2396_p6, %p2395_p5 }
 0x2a0   : > { %p2393_p3 = pneg %p2392_p2 }
 0x2a1   : > { %p2399_p10 = por %p2398_p9, %p2397_p7 }
 0x2a3   : > { %p2400_p11 = pnand %p2399_p10, %p2393_p3 }
 0x2a5   : > { %2403 = shalt.err (!%p2400_p11)
}
 0x2a6   : > { %2209 = dma.vmem_to_hbm [thread:$0]  (%p2539_p4), %s3125_s26, 16, %s3123_s14, %s1728_s24  }
 0x2a7 PF: > { %p2223_p12 = scmp.ge.s32.totalorder %s2458_s20, 2  ;;  %s1790_s30 = sand.u32 1, %s2438_s15  }
 0x2a8   : > { %s1791_s29 = scalar_lea.sflag [#allocation3], %s1790_s30 }
 0x2a9   : > { %p2214_p13 = pnand %p2223_p12, %p2548_p8 }
 0x2ab   : > { %2429 = dma.done.wait (!%p2214_p13), %s1791_s29, 2048  }
 0x2ac   : > { %2431 = vsyncadd (!%p2214_p13), %s1791_s29, 4294965248  ;;  %s1799_s5 = sand.u32 1, %s1913_s22  }
 0x2ad   : > { %s1800_s25 = scalar_lea.sflag [#allocation5], %s1799_s5 }
 0x2ae   : > { %2433 = dma.done.wait (!%p2214_p13), %s1800_s25, 32  }
 0x2af   : > { %2435 = vsyncadd (!%p2214_p13), %s1800_s25, 4294967264  ;;  %s21_s20 = sadd.s32 1, %s2458_s20   ;;  %s3207_s15 = smov %s2442_s16 }
 0x2b0   : > { %p18_p4 = scmp.ge.s32.totalorder %s21_s20, 4   ;;  %s3208_s16 = smov %s2446_s17 }
 0x2b1   : > { %s3209_s17 = smov %s2554_s28  ;;  %s3210_s18 = smov %s2454_s19 }
 0x2b2   : > { %s3211_s19 = smov %s3213_s23  ;;  %20 = sbr.rel (!%p18_p4) target bundleno = 6 (0x6), region = 95 }
 0x2b9   :  { %1812 = vsyncpa [#allocation3], 1 }
 0x2ba   :  { %1814 = vsyncpa [#allocation3 + $0x1], 1 }
 0x2bb   :  { %1815 = vsyncpa [#allocation5], 1 }
 0x2bc   :  { %1817 = vsyncpa [#allocation5 + $0x1], 1 }

</bundles_post_ra>
